<compile_context>
chip_gen: v7x
topology: tpu7x:2x2x1
jax: 0.10.0
libtpu: 0.0.40
codegen_flags: <defaults>
</compile_context>

<pallas_src>
import jax
import jax.numpy as jnp
from jax.experimental import pallas as pl
from jax.experimental.pallas import tpu as pltpu

EPS = 1e-5


def _fused_kernel(a_ref, b_ref, w_ref, gamma_ref, beta_ref, o_ref):
    # a_ref, b_ref: [Cin, M]        (x144 / x130 viewed as [Cin, H*W], N == 1)
    # w_ref:        [Cout_blk, Cin] (1x1 conv weight slice, native layout)
    # gamma/beta:   [Cout_blk, 1]
    # o_ref:        [Cout_blk, M]
    x = a_ref[...] + b_ref[...]                                  # x145, f32 add

    # 1x1 conv as W @ X on the MXU: bf16 operands, f32 accumulation (x146).
    y = jnp.dot(w_ref[...].astype(jnp.bfloat16),
                x.astype(jnp.bfloat16),
                preferred_element_type=jnp.float32)              # [Cout_blk, M]

    # BatchNorm2d (training-mode biased batch stats over N*H*W), single pass:
    # accumulate sum(y) and sum(y*y) from the same resident copy of y.
    inv_m = 1.0 / y.shape[1]
    mean = jnp.sum(y, axis=1, keepdims=True) * inv_m             # [Cout_blk, 1]
    ex2 = jnp.sum(y * y, axis=1, keepdims=True) * inv_m
    var = ex2 - mean * mean                                      # biased var
    inv_std = jax.lax.rsqrt(var + EPS)

    # Fold affine: out = y * scale + shift  (2 VALU ops per element).
    scale = gamma_ref[...] * inv_std                             # [Cout_blk, 1]
    shift = beta_ref[...] - mean * scale
    o_ref[...] = (y * scale + shift).astype(o_ref.dtype)         # x147


def fused_add_conv1x1_bn(x144, x130, weight, gamma, beta, *, cout_blocks=2):
    """x144, x130: [1, Cin, H, W] (NCHW, N must be 1 as in the module).
    weight: [Cout, Cin] (1x1 conv kernel squeezed, native layout — no transpose).
    gamma, beta: [Cout].
    Returns: [1, Cout, H, W] (NCHW, via a pure reshape — no transposes)."""
    N, Cin, H, W = x144.shape
    assert N == 1, "zero-transpose [Cin, H*W] formulation relies on N == 1"
    Cout = weight.shape[0]
    M = H * W

    # Pure views, no data movement.
    a2d = x144.reshape(Cin, M)
    b2d = x130.reshape(Cin, M)
    g2d = gamma.reshape(Cout, 1)
    be2d = beta.reshape(Cout, 1)

    # Split Cout across the (parallel) grid: engages both TensorCores on
    # megacore parts (v7x); on single-TC chips (v5e/v6e) the extra grid step
    # costs ~0.35 us, negligible.  BN stats are per channel, so the split
    # needs no cross-step reduction.  Set cout_blocks=1 for single-TC-only use.
    assert Cout % cout_blocks == 0 and (Cout // cout_blocks) % 8 == 0
    cb = Cout // cout_blocks

    out2d = pl.pallas_call(
        _fused_kernel,
        out_shape=jax.ShapeDtypeStruct((Cout, M), x144.dtype),
        grid=(cout_blocks,),
        in_specs=[
            pl.BlockSpec((Cin, M), lambda i: (0, 0)),    # x144 view (resident)
            pl.BlockSpec((Cin, M), lambda i: (0, 0)),    # x130 view (resident)
            pl.BlockSpec((cb, Cin), lambda i: (i, 0)),   # weight slice
            pl.BlockSpec((cb, 1), lambda i: (i, 0)),     # gamma slice
            pl.BlockSpec((cb, 1), lambda i: (i, 0)),     # beta slice
        ],
        out_specs=pl.BlockSpec((cb, M), lambda i: (i, 0)),
        compiler_params=pltpu.CompilerParams(
            dimension_semantics=("parallel",)),
    )(a2d, b2d, weight, g2d, be2d)

    # [Cout, M] -> [1, Cout, H, W]  (pure reshape, no transpose).
    return out2d.reshape(N, Cout, H, W)


if __name__ == "__main__":
    # Shapes implied by the module: [1, 96, 14, 14] inputs, Conv2d(96 -> 576, 1x1).
    N, Cin, H, W = 1, 96, 14, 14
    Cout = 576

    key = jax.random.PRNGKey(0)
    k1, k2, k3, k4, k5 = jax.random.split(key, 5)

    x144 = jax.random.normal(k1, (N, Cin, H, W), dtype=jnp.float32)
    x130 = jax.random.normal(k2, (N, Cin, H, W), dtype=jnp.float32)

    # Deterministic synthetic parameters (no checkpoint loading).
    weight = jax.random.normal(k3, (Cout, Cin), dtype=jnp.float32) * 0.05  # 1x1 conv
    gamma = 1.0 + 0.1 * jax.random.normal(k4, (Cout,), dtype=jnp.float32)  # BN weight
    beta = 0.1 * jax.random.normal(k5, (Cout,), dtype=jnp.float32)         # BN bias

    out = jax.jit(fused_add_conv1x1_bn)(x144, x130, weight, gamma, beta)
    jax.block_until_ready(out)

    # Reference in plain f32 JAX (same module semantics).
    x145 = x144 + x130
    a2d = x145.reshape(Cin, H * W)
    y = weight @ a2d                                   # [Cout, M]
    mean = jnp.mean(y, axis=1, keepdims=True)
    var = jnp.mean((y - mean) ** 2, axis=1, keepdims=True)
    ref2d = (y - mean) / jnp.sqrt(var + EPS) * gamma[:, None] + beta[:, None]
    ref = ref2d.reshape(N, Cout, H, W)

    assert out.shape == (N, Cout, H, W)
    # Tolerance accounts for bf16 MXU inputs (f32 accumulation) vs. f32 reference.
    max_err = float(jnp.max(jnp.abs(out - ref)))
    assert jnp.allclose(out, ref, atol=5e-2, rtol=5e-2), max_err
    print("KERNEL_OK")
</pallas_src>

<mosaic_0001>
module attributes {stable_mosaic.version = 11 : i64} {
  func.func @_fused_kernel(%arg0: i32, %arg1: memref<96x196xf32, #tpu.memory_space<vmem>>, %arg2: memref<96x196xf32, #tpu.memory_space<vmem>>, %arg3: memref<288x96xf32, #tpu.memory_space<vmem>>, %arg4: memref<288x1xf32, #tpu.memory_space<vmem>>, %arg5: memref<288x1xf32, #tpu.memory_space<vmem>>, %arg6: memref<288x196xf32, #tpu.memory_space<vmem>>) attributes {dimension_semantics = [#tpu.dimension_semantics<parallel>], iteration_bounds = array<i64: 2>, scalar_prefetch = 0 : i64, scratch_operands = 0 : i64, tpu.core_type = #tpu.core_type<tc>, window_params = [{pipeline_mode = #tpu.pipeline_mode<synchronous>, transform_indices = @transform_0, window_bounds = array<i64: 96, 196>}, {pipeline_mode = #tpu.pipeline_mode<synchronous>, transform_indices = @transform_1, window_bounds = array<i64: 96, 196>}, {transform_indices = @transform_2, window_bounds = array<i64: 288, 96>}, {transform_indices = @transform_3, window_bounds = array<i64: 288, 1>}, {transform_indices = @transform_4, window_bounds = array<i64: 288, 1>}, {transform_indices = @transform_5, window_bounds = array<i64: 288, 196>}]} {
    %c0 = arith.constant 0 : index
    %c0_0 = arith.constant 0 : index
    %0 = vector.load %arg1[%c0, %c0_0] : memref<96x196xf32, #tpu.memory_space<vmem>>, vector<96x196xf32>
    %c0_1 = arith.constant 0 : index
    %c0_2 = arith.constant 0 : index
    %1 = vector.load %arg2[%c0_1, %c0_2] : memref<96x196xf32, #tpu.memory_space<vmem>>, vector<96x196xf32>
    %2 = arith.addf %0, %1 : vector<96x196xf32>
    %c0_3 = arith.constant 0 : index
    %c0_4 = arith.constant 0 : index
    %3 = vector.load %arg3[%c0_3, %c0_4] : memref<288x96xf32, #tpu.memory_space<vmem>>, vector<288x96xf32>
    %4 = arith.truncf %3 : vector<288x96xf32> to vector<288x96xbf16>
    %5 = arith.truncf %2 : vector<96x196xf32> to vector<96x196xbf16>
    %cst = arith.constant dense<0.000000e+00> : vector<288x196xf32>
    %6 = tpu.matmul %4, %5, %cst {dimension_numbers = #tpu.dot_dimension_numbers<[1], [0], [0], [1], [0, 0, 1, 1], [], []>} : vector<288x96xbf16>, vector<96x196xbf16>, vector<288x196xf32> -> vector<288x196xf32>
    %cst_5 = arith.constant dense<0.000000e+00> : vector<288xf32>
    %7 = vector.multi_reduction <add>, %6, %cst_5 [1] : vector<288x196xf32> to vector<288xf32>
    %8 = vector.shape_cast %7 : vector<288xf32> to vector<288x1xf32>
    %cst_6 = arith.constant 0.00510204071 : f32
    %9 = vector.broadcast %cst_6 : f32 to vector<288x1xf32>
    %10 = arith.mulf %8, %9 : vector<288x1xf32>
    %11 = arith.mulf %6, %6 : vector<288x196xf32>
    %cst_7 = arith.constant dense<0.000000e+00> : vector<288xf32>
    %12 = vector.multi_reduction <add>, %11, %cst_7 [1] : vector<288x196xf32> to vector<288xf32>
    %13 = vector.shape_cast %12 : vector<288xf32> to vector<288x1xf32>
    %cst_8 = arith.constant 0.00510204071 : f32
    %14 = vector.broadcast %cst_8 : f32 to vector<288x1xf32>
    %15 = arith.mulf %13, %14 : vector<288x1xf32>
    %16 = arith.mulf %10, %10 : vector<288x1xf32>
    %17 = arith.subf %15, %16 : vector<288x1xf32>
    %cst_9 = arith.constant 9.99999974E-6 : f32
    %18 = vector.broadcast %cst_9 : f32 to vector<288x1xf32>
    %19 = arith.addf %17, %18 : vector<288x1xf32>
    %20 = math.rsqrt %19 : vector<288x1xf32>
    %c0_10 = arith.constant 0 : index
    %c0_11 = arith.constant 0 : index
    %21 = vector.load %arg4[%c0_10, %c0_11] : memref<288x1xf32, #tpu.memory_space<vmem>>, vector<288x1xf32>
    %22 = arith.mulf %21, %20 : vector<288x1xf32>
    %c0_12 = arith.constant 0 : index
    %c0_13 = arith.constant 0 : index
    %23 = vector.load %arg5[%c0_12, %c0_13] : memref<288x1xf32, #tpu.memory_space<vmem>>, vector<288x1xf32>
    %24 = arith.mulf %10, %22 : vector<288x1xf32>
    %25 = arith.subf %23, %24 : vector<288x1xf32>
    %26 = vector.broadcast %22 : vector<288x1xf32> to vector<288x196xf32>
    %27 = arith.mulf %6, %26 : vector<288x196xf32>
    %28 = vector.broadcast %25 : vector<288x1xf32> to vector<288x196xf32>
    %29 = arith.addf %27, %28 : vector<288x196xf32>
    %c0_14 = arith.constant 0 : index
    %c0_15 = arith.constant 0 : index
    %30 = vector.load %arg6[%c0_14, %c0_15] : memref<288x196xf32, #tpu.memory_space<vmem>>, vector<288x196xf32>
    tpu.vector_store %arg6[%c0_14, %c0_15], %29 {strides = array<i32>} : memref<288x196xf32, #tpu.memory_space<vmem>>, vector<288x196xf32>,
    return
  }
  func.func @transform_0(%arg0: i32) -> (i32, i32) {
    %c0_i32 = arith.constant 0 : i32
    %c0_i32_0 = arith.constant 0 : i32
    %c0_i32_1 = arith.constant 0 : i32
    return %c0_i32, %c0_i32_0 : i32, i32
  }
  func.func @transform_1(%arg0: i32) -> (i32, i32) {
    %c0_i32 = arith.constant 0 : i32
    %c0_i32_0 = arith.constant 0 : i32
    %c0_i32_1 = arith.constant 0 : i32
    return %c0_i32, %c0_i32_0 : i32, i32
  }
  func.func @transform_2(%arg0: i32) -> (i32, i32) {
    %c0_i32 = arith.constant 0 : i32
    %c0_i32_0 = arith.constant 0 : i32
    return %arg0, %c0_i32 : i32, i32
  }
  func.func @transform_3(%arg0: i32) -> (i32, i32) {
    %c0_i32 = arith.constant 0 : i32
    %c0_i32_0 = arith.constant 0 : i32
    return %arg0, %c0_i32 : i32, i32
  }
  func.func @transform_4(%arg0: i32) -> (i32, i32) {
    %c0_i32 = arith.constant 0 : i32
    %c0_i32_0 = arith.constant 0 : i32
    return %arg0, %c0_i32 : i32, i32
  }
  func.func @transform_5(%arg0: i32) -> (i32, i32) {
    %c0_i32 = arith.constant 0 : i32
    %c0_i32_0 = arith.constant 0 : i32
    return %arg0, %c0_i32 : i32, i32
  }
}

</mosaic_0001>

<bundles_post_ra>
// kernel: fused_add_conv1x1_bn.1
= control target key start
LH: loop header
LB: loop body
LE: loop exit
PB: predicated region body
PF: predicated region fallthrough
CT: control target
= control target key end

     0   :  { %s2261_s18 = smov 0   ;;  %s3558_s0 = inlined_call_operand.vmem [shape: f32[96,196], index: 0, kind: input, shape index: {}]   ;;  %s3559_s1 = inlined_call_operand.vmem [shape: f32[96,196], index: 1, kind: input, shape index: {}]   ;;  %s3560_s2 = inlined_call_operand.vmem [shape: f32[576,96], index: 2, kind: input, shape index: {}]   ;;  %s3561_s3 = inlined_call_operand.vmem [shape: f32[576,1], index: 3, kind: input, shape index: {}]   ;;  %s3562_s4 = inlined_call_operand.vmem [shape: f32[576,1], index: 4, kind: input, shape index: {}]   ;;  %s3563_s5 = inlined_call_operand.vmem [shape: f32[576,196], index: 5, kind: output, shape index: {}]  }
   0x1 LB: > { %s2096_s19 = sadd.s32 4294967295, %s2228_s18   ;;  %p2100_p0 = scmp.ge.s32.totalorder %s2228_s18, 1  ;;  %s2228_s18 = sphi %s2261_s18, %s15_s18  }
   0x2   : > { %p210_p1 = scmp.lt.s32.totalorder %s2228_s18, 3 }
   0x4   : > { %p211_p2 = pnand %p2100_p0, %p210_p1 }
   0x6   : > { %214 = sbr.rel (%p211_p2) target bundleno = 719 (0x2cf), region = 40 }
   0xd   : > { %v276_v0 = vld [vmem:[%s3558_s0 + $0x8] sm:$0xff]  ;;  %v278_v1 = vld [vmem:[%s3558_s0 + $0x18] sm:$0xff]  ;;  %v275_v5 = vld [vmem:[%s3558_s0] sm:$0xff]  ;;  %v2230_v7 = vmov 0   ;;  %s2320_s27 = smul.u32 36, %s2096_s19  ;;  %vm413_vm0 = vcmask 785408  }
   0xe   : > { %v300_v2 = vld [vmem:[%s3559_s1 + $0x8] sm:$0xff]  ;;  %v302_v3 = vld [vmem:[%s3559_s1 + $0x18] sm:$0xff]  ;;  %v277_v6 = vld [vmem:[%s3558_s0 + $0x10] sm:$0xff]  ;;  %500 = vmatprep.mubr.bf16.mxu0 %v2230_v7  ;;  %590 = vmatprep.mubr.bf16.mxu1 %v2230_v7  ;;  %vm681_vm1 = vcmask 556032  }
   0xf   : > { %v324_v4 = vadd.f32 %v300_v2, %v276_v0  ;;  %v326_v8 = vadd.f32 %v302_v3, %v278_v1  ;;  %v299_v9 = vld [vmem:[%s3559_s1] sm:$0xff]  ;;  %v301_v10 = vld [vmem:[%s3559_s1 + $0x10] sm:$0xff]  ;;  %v280_v11 = vld [vmem:[%s3558_s0 + $0x28] sm:$0xff]  ;;  %2148 = vset.pattern.permute.xlu0 %v2230_v7  ;;  %2149 = vset.pattern.permute.xlu1 %v2230_v7  ;;  %p250_p3 = scmp.lt.s32.totalorder %s2320_s27, 71 }
  0x10   : > { %v323_v12 = vadd.f32 %v299_v9, %v275_v5  ;;  %v325_v13 = vadd.f32 %v301_v10, %v277_v6  ;;  %v282_v14 = vld [vmem:[%s3558_s0 + $0x38] sm:$0xff]  ;;  %v304_v15 = vld [vmem:[%s3559_s1 + $0x28] sm:$0xff]  ;;  %v279_v20 = vld [vmem:[%s3558_s0 + $0x20] sm:$0xff] }
  0x11   : > { %v306_v16 = vld [vmem:[%s3559_s1 + $0x38] sm:$0xff]  ;;  %v402_v17 = vpack.c.bf16 %v326_v8, %v324_v4  ;;  %v328_v18 = vadd.f32 %v304_v15, %v280_v11  ;;  %v281_v21 = vld [vmem:[%s3558_s0 + $0x30] sm:$0xff]  ;;  %v303_v22 = vld [vmem:[%s3559_s1 + $0x20] sm:$0xff]  ;;  %s3751_s27 = smov (!%p250_p3, %s2320_s27), 71 }
  0x12   : > { %v330_v19 = vadd.f32 %v306_v16, %v282_v14  ;;  %v401_v23 = vpack.c.bf16 %v325_v13, %v323_v12  ;;  %v305_v24 = vld [vmem:[%s3559_s1 + $0x30] sm:$0xff]  ;;  %v327_v25 = vadd.f32 %v303_v22, %v279_v20  ;;  %v284_v26 = vld [vmem:[%s3558_s0 + $0x48] sm:$0xff]  ;;  %v286_v27 = vld [vmem:[%s3558_s0 + $0x58] sm:$0xff]  ;;  %s2428_s24 = sshll.u32 %s3751_s27, 3  ;;  %s2126_s9 = sshll.u32 %s3751_s27, 4 }
  0x13   : > { %468 = vmatprep.subr.bf16.mxu0 %v402_v17  ;;  %2127 = vmatprep.subr.bf16.mxu1 %v402_v17  ;;  %v329_v29 = vadd.f32 %v305_v24, %v281_v21  ;;  %v308_v30 = vld [vmem:[%s3559_s1 + $0x48] sm:$0xff]  ;;  %v310_v31 = vld [vmem:[%s3559_s1 + $0x58] sm:$0xff]  ;;  %v283_v32 = vld [vmem:[%s3558_s0 + $0x40] sm:$0xff]  ;;  %s2434_s28 = scalar_lea.vmem %s3560_s2, %s2428_s24  ;;  %s3121_s6 = scalar_lea.vmem %s3561_s3, %s2428_s24 }
  0x14   : > { %v404_v28 = vpack.c.bf16 %v330_v19, %v328_v18  ;;  %469 = vmatpush1.bf16.msra.mxu0 %v401_v23  ;;  %2133 = vmatpush1.bf16.msra.mxu1 %v401_v23  ;;  %v332_v33 = vadd.f32 %v308_v30, %v284_v26  ;;  %v334_v34 = vadd.f32 %v310_v31, %v286_v27  ;;  %v285_v35 = vld [vmem:[%s3558_s0 + $0x50] sm:$0xff]  ;;  %v307_v36 = vld [vmem:[%s3559_s1 + $0x40] sm:$0xff]  ;;  %v288_v41 = vld [vmem:[%s3558_s0 + $0x68] sm:$0xff]  ;;  %s3143_s19 = scalar_lea.vmem %s3562_s4, %s2428_s24  ;;  %s3369_s12 = scalar_lea.vmem %s3563_s5, %s2126_s9 }
  0x15   : > { %v309_v37 = vld [vmem:[%s3559_s1 + $0x50] sm:$0xff]  ;;  %v403_v38 = vpack.c.bf16 %v329_v29, %v327_v25  ;;  %v331_v39 = vadd.f32 %v307_v36, %v283_v32  ;;  %v290_v42 = vld [vmem:[%s3558_s0 + $0x78] sm:$0xff]  ;;  %v312_v43 = vld [vmem:[%s3559_s1 + $0x68] sm:$0xff] }
  0x16   : > { %470 = vmatprep.subr.bf16.mxu0 %v404_v28  ;;  %2128 = vmatprep.subr.bf16.mxu1 %v404_v28  ;;  %v333_v40 = vadd.f32 %v309_v37, %v285_v35  ;;  %v406_v44 = vpack.c.bf16 %v334_v34, %v332_v33  ;;  %v314_v45 = vld [vmem:[%s3559_s1 + $0x78] sm:$0xff]  ;;  %v336_v46 = vadd.f32 %v312_v43, %v288_v41  ;;  %v287_v47 = vld [vmem:[%s3558_s0 + $0x60] sm:$0xff]  ;;  %v289_v48 = vld [vmem:[%s3558_s0 + $0x70] sm:$0xff] }
  0x17   : > { %v338_v49 = vadd.f32 %v314_v45, %v290_v42  ;;  %v311_v50 = vld [vmem:[%s3559_s1 + $0x60] sm:$0xff]  ;;  %v313_v51 = vld [vmem:[%s3559_s1 + $0x70] sm:$0xff]  ;;  %v292_v52 = vld [vmem:[%s3558_s0 + $0x88] sm:$0xff] }
  0x18   : > { %471 = vmatpush1.bf16.msra.mxu0 %v403_v38  ;;  %2134 = vmatpush1.bf16.msra.mxu1 %v403_v38  ;;  %v405_v53 = vpack.c.bf16 %v333_v40, %v331_v39  ;;  %v335_v54 = vadd.f32 %v311_v50, %v287_v47  ;;  %v337_v55 = vadd.f32 %v313_v51, %v289_v48  ;;  %v294_v56 = vld [vmem:[%s3558_s0 + $0x98] sm:$0xff]  ;;  %v316_v57 = vld [vmem:[%s3559_s1 + $0x88] sm:$0xff]  ;;  %v291_v62 = vld [vmem:[%s3558_s0 + $0x80] sm:$0xff] }
  0x19   : > { %v318_v58 = vld [vmem:[%s3559_s1 + $0x98] sm:$0xff]  ;;  %472 = vmatprep.subr.bf16.mxu0 %v406_v44  ;;  %2129 = vmatprep.subr.bf16.mxu1 %v406_v44  ;;  %v408_v59 = vpack.c.bf16 %v338_v49, %v336_v46  ;;  %v340_v60 = vadd.f32 %v316_v57, %v292_v52  ;;  %v293_v63 = vld [vmem:[%s3558_s0 + $0x90] sm:$0xff]  ;;  %v315_v0 = vld [vmem:[%s3559_s1 + $0x80] sm:$0xff] }
  0x1a   : > { %v342_v61 = vadd.f32 %v318_v58, %v294_v56  ;;  %v317_v1 = vld [vmem:[%s3559_s1 + $0x90] sm:$0xff]  ;;  %v296_v2 = vld [vmem:[%s3558_s0 + $0xa8] sm:$0xff]  ;;  %v298_v3 = vld [vmem:[%s3558_s0 + $0xb8] sm:$0xff]  ;;  %v407_v6 = vpack.c.bf16 %v337_v55, %v335_v54  ;;  %v339_v8 = vadd.f32 %v315_v0, %v291_v62 }
  0x1b   : > { %v320_v4 = vld [vmem:[%s3559_s1 + $0xa8] sm:$0xff]  ;;  %v322_v5 = vld [vmem:[%s3559_s1 + $0xb8] sm:$0xff]  ;;  %v341_v9 = vadd.f32 %v317_v1, %v293_v63  ;;  %v295_v10 = vld [vmem:[%s3558_s0 + $0xa0] sm:$0xff] }
  0x1c   : > { %473 = vmatpush1.bf16.msra.mxu0 %v405_v53  ;;  %2135 = vmatpush1.bf16.msra.mxu1 %v405_v53  ;;  %v410_v11 = vpack.c.bf16 %v342_v61, %v340_v60  ;;  %v344_v12 = vadd.f32 %v320_v4, %v296_v2  ;;  %v346_v13 = vadd.f32 %v322_v5, %v298_v3  ;;  %v297_v14 = vld [vmem:[%s3558_s0 + $0xb0] sm:$0xff]  ;;  %v319_v15 = vld [vmem:[%s3559_s1 + $0xa0] sm:$0xff]  ;;  %v348_v23 = vld [vmem:[%s2434_s28 + $0x8] sm:$0xff] }
  0x1d   : > { %474 = vmatprep.subr.bf16.mxu0 %v408_v59  ;;  %2130 = vmatprep.subr.bf16.mxu1 %v408_v59  ;;  %v321_v16 = vld [vmem:[%s3559_s1 + $0xb0] sm:$0xff]  ;;  %v409_v17 = vpack.c.bf16 %v341_v9, %v339_v8  ;;  %v343_v18 = vadd.f32 %v319_v15, %v295_v10  ;;  %v347_v21 = vld [vmem:[%s2434_s28] sm:$0xff]  ;;  %v366_v25 = vld [vmem:[%s2434_s28 + $0x98] sm:$0xff] }
  0x1e   : > { %v345_v19 = vadd.f32 %v321_v16, %v297_v14  ;;  %v412_v20 = vpack.c.bf16 %v346_v13, %v344_v12  ;;  %v365_v24 = vld [vmem:[%s2434_s28 + $0x90] sm:$0xff]  ;;  %v383_v26 = vpack.c.bf16 %v348_v23, %v347_v21  ;;  %v350_v29 = vld [vmem:[%s2434_s28 + $0x18] sm:$0xff]  ;;  %v367_v30 = vld [vmem:[%s2434_s28 + $0xa0] sm:$0xff] }
  0x1f   : > { %v392_v27 = vpack.c.bf16 %v366_v25, %v365_v24  ;;  %v349_v28 = vld [vmem:[%s2434_s28 + $0x10] sm:$0xff]  ;;  %v368_v31 = vld [vmem:[%s2434_s28 + $0xa8] sm:$0xff]  ;;  %v351_v34 = vld [vmem:[%s2434_s28 + $0x20] sm:$0xff] }
  0x20   : > { %475 = vmatpush1.bf16.msra.mxu0 %v407_v6  ;;  %2136 = vmatpush1.bf16.msra.mxu1 %v407_v6  ;;  %v411_v22 = vpack.c.bf16 %v345_v19, %v343_v18  ;;  %v384_v32 = vpack.c.bf16 %v350_v29, %v349_v28  ;;  %v393_v33 = vpack.c.bf16 %v368_v31, %v367_v30  ;;  %v352_v35 = vld [vmem:[%s2434_s28 + $0x28] sm:$0xff]  ;;  %v369_v36 = vld [vmem:[%s2434_s28 + $0xb0] sm:$0xff]  ;;  %v370_v37 = vld [vmem:[%s2434_s28 + $0xb8] sm:$0xff] }
  0x21   : > { %476 = vmatprep.subr.bf16.mxu0 %v410_v11  ;;  %2131 = vmatprep.subr.bf16.mxu1 %v410_v11  ;;  %v385_v38 = vpack.c.bf16 %v352_v35, %v351_v34  ;;  %v394_v39 = vpack.c.bf16 %v370_v37, %v369_v36  ;;  %v353_v40 = vld [vmem:[%s2434_s28 + $0x30] sm:$0xff]  ;;  %v354_v41 = vld [vmem:[%s2434_s28 + $0x38] sm:$0xff]  ;;  %v371_v42 = vld [vmem:[%s2434_s28 + $0xc0] sm:$0xff] }
  0x22   : > { %v372_v43 = vld [vmem:[%s2434_s28 + $0xc8] sm:$0xff]  ;;  %v386_v44 = vpack.c.bf16 %v354_v41, %v353_v40  ;;  %v355_v46 = vld [vmem:[%s2434_s28 + $0x40] sm:$0xff]  ;;  %v373_v48 = vld [vmem:[%s2434_s28 + $0xd0] sm:$0xff] }
  0x23   : > { %v395_v45 = vpack.c.bf16 %v372_v43, %v371_v42  ;;  %v356_v47 = vld [vmem:[%s2434_s28 + $0x48] sm:$0xff]  ;;  %v374_v49 = vld [vmem:[%s2434_s28 + $0xd8] sm:$0xff]  ;;  %v357_v52 = vld [vmem:[%s2434_s28 + $0x50] sm:$0xff] }
  0x24   : > { %477 = vmatpush1.bf16.msra.mxu0 %v409_v17  ;;  %2137 = vmatpush1.bf16.msra.mxu1 %v409_v17  ;;  %v387_v50 = vpack.c.bf16 %v356_v47, %v355_v46  ;;  %v396_v51 = vpack.c.bf16 %v374_v49, %v373_v48  ;;  %v358_v53 = vld [vmem:[%s2434_s28 + $0x58] sm:$0xff]  ;;  %v375_v54 = vld [vmem:[%s2434_s28 + $0xe0] sm:$0xff]  ;;  %v376_v55 = vld [vmem:[%s2434_s28 + $0xe8] sm:$0xff] }
  0x25   : > { %478 = vmatprep.subr.bf16.mxu0 %v412_v20  ;;  %2132 = vmatprep.subr.bf16.mxu1 %v412_v20  ;;  %v388_v56 = vpack.c.bf16 %v358_v53, %v357_v52  ;;  %v397_v57 = vpack.c.bf16 %v376_v55, %v375_v54  ;;  %v359_v58 = vld [vmem:[%s2434_s28 + $0x60] sm:$0xff]  ;;  %v360_v59 = vld [vmem:[%s2434_s28 + $0x68] sm:$0xff]  ;;  %v377_v60 = vld [vmem:[%s2434_s28 + $0xf0] sm:$0xff] }
  0x26   : > { %v378_v61 = vld [vmem:[%s2434_s28 + $0xf8] sm:$0xff]  ;;  %v389_v62 = vpack.c.bf16 %v360_v59, %v359_v58  ;;  %v361_v0 = vld [vmem:[%s2434_s28 + $0x70] sm:$0xff]  ;;  %v379_v2 = vld [vmem:[%s2434_s28 + $0x100] sm:$0xff] }
  0x27   : > { %v398_v63 = vpack.c.bf16 %v378_v61, %v377_v60  ;;  %v362_v1 = vld [vmem:[%s2434_s28 + $0x78] sm:$0xff]  ;;  %v380_v3 = vld [vmem:[%s2434_s28 + $0x108] sm:$0xff]  ;;  %v363_v6 = vld [vmem:[%s2434_s28 + $0x80] sm:$0xff] }
  0x28   : > { %479 = vmatpush1.bf16.msra.mxu0 %v411_v22  ;;  %2138 = vmatpush1.bf16.msra.mxu1 %v411_v22  ;;  %v390_v4 = vpack.c.bf16 %v362_v1, %v361_v0  ;;  %v399_v5 = vpack.c.bf16 %v380_v3, %v379_v2  ;;  %v364_v8 = vld [vmem:[%s2434_s28 + $0x88] sm:$0xff]  ;;  %v381_v9 = vld [vmem:[%s2434_s28 + $0x110] sm:$0xff]  ;;  %v382_v10 = vld [vmem:[%s2434_s28 + $0x118] sm:$0xff] }
  0x29   : > { %v391_v11 = vpack.c.bf16 %v364_v8, %v363_v6  ;;  %v400_v12 = vpack.c.bf16 %v382_v10, %v381_v9 }
  0x2b   : > { %2106 = vmatmul.mubr.msk.bf16.vlgmr.msra.gmra.mrb[0].mxu0 %vm413_vm0, %v383_v26  ;;  %2115 = vmatmul.mubr.msk.bf16.vlgmr.msra.gmra.mrb[0].mxu1 %vm413_vm0, %v392_v27 }
  0x2c   : > { %510 = vmatprep.mubr.bf16.mxu0 %v2230_v7  ;;  %600 = vmatprep.mubr.bf16.mxu1 %v2230_v7 }
  0x33   : > { %2107 = vmatmul.mubr.msk.bf16.gmra.mrb[4].mxu0 %vm413_vm0, %v384_v32  ;;  %2116 = vmatmul.mubr.msk.bf16.gmra.mrb[4].mxu1 %vm413_vm0, %v393_v33 }
  0x34   : > { %520 = vmatprep.mubr.bf16.mxu0 %v2230_v7  ;;  %610 = vmatprep.mubr.bf16.mxu1 %v2230_v7 }
  0x3b   : > { %2108 = vmatmul.mubr.msk.bf16.gmra.mrb[8].mxu0 %vm413_vm0, %v385_v38  ;;  %2117 = vmatmul.mubr.msk.bf16.gmra.mrb[8].mxu1 %vm413_vm0, %v394_v39 }
  0x3c   : > { %530 = vmatprep.mubr.bf16.mxu0 %v2230_v7  ;;  %620 = vmatprep.mubr.bf16.mxu1 %v2230_v7 }
  0x43   : > { %2109 = vmatmul.mubr.msk.bf16.gmra.mrb[12].mxu0 %vm413_vm0, %v386_v44  ;;  %2118 = vmatmul.mubr.msk.bf16.gmra.mrb[12].mxu1 %vm413_vm0, %v395_v45 }
  0x44   : > { %540 = vmatprep.mubr.bf16.mxu0 %v2230_v7  ;;  %630 = vmatprep.mubr.bf16.mxu1 %v2230_v7 }
  0x4b   : > { %2110 = vmatmul.mubr.msk.bf16.gmra.mrb[16].mxu0 %vm413_vm0, %v387_v50  ;;  %2119 = vmatmul.mubr.msk.bf16.gmra.mrb[16].mxu1 %vm413_vm0, %v396_v51 }
  0x4c   : > { %550 = vmatprep.mubr.bf16.mxu0 %v2230_v7  ;;  %640 = vmatprep.mubr.bf16.mxu1 %v2230_v7 }
  0x53   : > { %2111 = vmatmul.mubr.msk.bf16.gmra.mrb[20].mxu0 %vm413_vm0, %v388_v56  ;;  %2120 = vmatmul.mubr.msk.bf16.gmra.mrb[20].mxu1 %vm413_vm0, %v397_v57 }
  0x54   : > { %560 = vmatprep.mubr.bf16.mxu0 %v2230_v7  ;;  %650 = vmatprep.mubr.bf16.mxu1 %v2230_v7 }
  0x5b   : > { %2112 = vmatmul.mubr.msk.bf16.gmra.mrb[24].mxu0 %vm413_vm0, %v389_v62  ;;  %2121 = vmatmul.mubr.msk.bf16.gmra.mrb[24].mxu1 %vm413_vm0, %v398_v63 }
  0x5c   : > { %570 = vmatprep.mubr.bf16.mxu0 %v2230_v7  ;;  %660 = vmatprep.mubr.bf16.mxu1 %v2230_v7 }
  0x63   : > { %2113 = vmatmul.mubr.msk.bf16.gmra.mrb[28].mxu0 %vm413_vm0, %v390_v4  ;;  %2122 = vmatmul.mubr.msk.bf16.gmra.mrb[28].mxu1 %vm413_vm0, %v399_v5 }
  0x64   : > { %580 = vmatprep.mubr.bf16.mxu0 %v2230_v7  ;;  %670 = vmatprep.mubr.bf16.mxu1 %v2230_v7 }
  0x6b   : > { %2114 = vmatmul.mubr.msk.bf16.gmra.mrb[32].mxu0 %vm413_vm0, %v391_v11  ;;  %2123 = vmatmul.mubr.msk.bf16.gmra.mrb[32].mxu1 %vm413_vm0, %v400_v12 }
  0xfe   : > { %v2506_v13 = vpop.f32.mrb[0].mxu0  ;;  %v2508_v14 = vpop.f32.mrb[0].mxu1 }
  0xff   : > { %v2510_v15 = vpop.f32.mrb[1].mxu0  ;;  %v2512_v16 = vpop.f32.mrb[1].mxu1  ;;  %v862_v7 = vmul.f32 %v2506_v13, %v2506_v13  ;;  %v898_v17 = vmul.f32 %v2508_v14, %v2508_v14 }
 0x100   : > { %v863_v18 = vmul.f32 %v2510_v15, %v2510_v15  ;;  %v899_v19 = vmul.f32 %v2512_v16, %v2512_v16  ;;  %v2522_v20 = vpop.f32.mrb[2].mxu0  ;;  %v2524_v21 = vpop.f32.mrb[2].mxu1  ;;  %v682_v22 = vsel %vm681_vm1, %v2510_v15, 0.0  ;;  %v754_v23 = vsel %vm681_vm1, %v2512_v16, 0.0 }
 0x101   : > { %v2530_v24 = vpop.f32.mrb[3].mxu0  ;;  %v2532_v25 = vpop.f32.mrb[3].mxu1  ;;  %v683_v26 = vadd.f32 %v682_v22, %v2506_v13  ;;  %v755_v27 = vadd.f32 %v754_v23, %v2508_v14  ;;  %v864_v28 = vmul.f32 %v2522_v20, %v2522_v20  ;;  %v900_v29 = vmul.f32 %v2524_v21, %v2524_v21 }
 0x102   : > { %v865_v30 = vmul.f32 %v2530_v24, %v2530_v24  ;;  %v901_v31 = vmul.f32 %v2532_v25, %v2532_v25  ;;  %v758_v32 = vsel %vm681_vm1, %v2532_v25, 0.0  ;;  %v686_v33 = vsel %vm681_vm1, %v2530_v24, 0.0 }
 0x103   : > { %684 = vadd.xlane.f32.xlu0 %v683_v26  ;;  %v759_v34 = vadd.f32 %v758_v32, %v2524_v21  ;;  %v687_v35 = vadd.f32 %v686_v33, %v2522_v20  ;;  %v934_v36 = vsel %vm681_vm1, %v863_v18, 0.0  ;;  %v1006_v37 = vsel %vm681_vm1, %v899_v19, 0.0 }
 0x104   : > { %v938_v38 = vsel %vm681_vm1, %v865_v30, 0.0  ;;  %v1010_v39 = vsel %vm681_vm1, %v901_v31, 0.0  ;;  %v935_v40 = vadd.f32 %v934_v36, %v862_v7  ;;  %v2554_v41 = vadd.f32 %v1006_v37, %v898_v17 }
 0x105   : > { %760 = vadd.xlane.f32.xlu1 %v759_v34  ;;  %v939_v42 = vadd.f32 %v938_v38, %v864_v28  ;;  %v1011_v43 = vadd.f32 %v1010_v39, %v900_v29 }
 0x106   : > { %v2556_v44 = vpop.f32.mrb[4].mxu0  ;;  %v2558_v45 = vpop.f32.mrb[4].mxu1 }
 0x107   : > { %3626 = vst [vmem:[#allocation2_spill] sm:$0xff] %v2556_v44  ;;  %3627 = vst [vmem:[#allocation3_spill] sm:$0xff] %v2558_v45  ;;  %756 = vadd.xlane.f32.xlu0 %v755_v27  ;;  %v2560_v46 = vpop.f32.mrb[5].mxu0  ;;  %v2562_v47 = vpop.f32.mrb[5].mxu1  ;;  %v866_v48 = vmul.f32 %v2556_v44, %v2556_v44  ;;  %v902_v49 = vmul.f32 %v2558_v45, %v2558_v45 }
 0x108   : > { %3628 = vst [vmem:[#allocation4_spill] sm:$0xff] %v2560_v46  ;;  %3629 = vst [vmem:[#allocation5_spill] sm:$0xff] %v2562_v47  ;;  %v867_v50 = vmul.f32 %v2560_v46, %v2560_v46  ;;  %v2570_v51 = vpop.f32.mrb[6].mxu0  ;;  %v690_v52 = vsel %vm681_vm1, %v2560_v46, 0.0  ;;  %v903_v53 = vmul.f32 %v2562_v47, %v2562_v47  ;;  %v2576_v54 = vpop.f32.mrb[6].mxu1  ;;  %v762_v55 = vsel %vm681_vm1, %v2562_v47, 0.0 }
 0x109   : > { %3630 = vst [vmem:[#allocation6_spill] sm:$0xff] %v2570_v51  ;;  %3631 = vst [vmem:[#allocation7_spill] sm:$0xff] %v2576_v54  ;;  %940 = vadd.xlane.f32.xlu1 %v939_v42  ;;  %v691_v56 = vadd.f32 %v690_v52, %v2556_v44  ;;  %v2581_v57 = vpop.f32.mrb[7].mxu0  ;;  %v2583_v58 = vpop.f32.mrb[7].mxu1  ;;  %v763_v59 = vadd.f32 %v762_v55, %v2558_v45  ;;  %v868_v60 = vmul.f32 %v2570_v51, %v2570_v51 }
 0x10a   : > { %3632 = vst [vmem:[#allocation8_spill] sm:$0xff] %v2581_v57  ;;  %3633 = vst [vmem:[#allocation9_spill] sm:$0xff] %v2583_v58  ;;  %v904_v61 = vmul.f32 %v2576_v54, %v2576_v54  ;;  %v869_v62 = vmul.f32 %v2581_v57, %v2581_v57  ;;  %v905_v63 = vmul.f32 %v2583_v58, %v2583_v58  ;;  %v694_v0 = vsel %vm681_vm1, %v2581_v57, 0.0 }
 0x10b   : > { %v766_v1 = vsel %vm681_vm1, %v2583_v58, 0.0  ;;  %688 = vadd.xlane.f32.xlu0 %v687_v35  ;;  %v695_v2 = vadd.f32 %v694_v0, %v2570_v51  ;;  %v942_v4 = vsel %vm681_vm1, %v867_v50, 0.0  ;;  %v1014_v5 = vsel %vm681_vm1, %v903_v53, 0.0 }
 0x10c   : > { %v767_v3 = vadd.f32 %v766_v1, %v2576_v54  ;;  %v2602_v6 = vadd.f32 %v942_v4, %v866_v48  ;;  %v946_v8 = vsel %vm681_vm1, %v869_v62, 0.0  ;;  %v2605_v9 = vadd.f32 %v1014_v5, %v902_v49 }
 0x10d   : > { %v1018_v10 = vsel %vm681_vm1, %v905_v63, 0.0  ;;  %1012 = vadd.xlane.f32.xlu1 %v1011_v43  ;;  %v2608_v11 = vadd.f32 %v946_v8, %v868_v60 }
 0x10e   : > { %v2610_v12 = vadd.f32 %v1018_v10, %v904_v61  ;;  %v2612_v7 = vpop.f32.mrb[8].mxu0  ;;  %v2614_v17 = vpop.f32.mrb[8].mxu1 }
 0x10f   : > { %3634 = vst [vmem:[#allocation10_spill] sm:$0xff] %v2612_v7  ;;  %3635 = vst [vmem:[#allocation11_spill] sm:$0xff] %v2614_v17  ;;  %936 = vadd.xlane.f32.xlu0 %v935_v40  ;;  %v2616_v18 = vpop.f32.mrb[9].mxu0  ;;  %v2618_v19 = vpop.f32.mrb[9].mxu1  ;;  %v870_v22 = vmul.f32 %v2612_v7, %v2612_v7  ;;  %v906_v23 = vmul.f32 %v2614_v17, %v2614_v17 }
 0x110   : > { %3636 = vst [vmem:[#allocation12_spill] sm:$0xff] %v2616_v18  ;;  %3637 = vst [vmem:[#allocation13_spill] sm:$0xff] %v2618_v19  ;;  %v871_v26 = vmul.f32 %v2616_v18, %v2616_v18  ;;  %v2626_v27 = vpop.f32.mrb[10].mxu0  ;;  %v907_v28 = vmul.f32 %v2618_v19, %v2618_v19  ;;  %v698_v29 = vsel %vm681_vm1, %v2616_v18, 0.0  ;;  %v2632_v30 = vpop.f32.mrb[10].mxu1  ;;  %v770_v31 = vsel %vm681_vm1, %v2618_v19, 0.0 }
 0x111   : > { %3638 = vst [vmem:[#allocation14_spill] sm:$0xff] %v2626_v27  ;;  %3639 = vst [vmem:[#allocation15_spill] sm:$0xff] %v2632_v30  ;;  %692 = vadd.xlane.f32.xlu1 %v691_v56  ;;  %v2636_v32 = vpop.f32.mrb[11].mxu0  ;;  %v2639_v33 = vadd.f32 %v698_v29, %v2612_v7  ;;  %v2641_v34 = vpop.f32.mrb[11].mxu1  ;;  %v2644_v35 = vadd.f32 %v770_v31, %v2614_v17  ;;  %v872_v36 = vmul.f32 %v2626_v27, %v2626_v27 }
 0x112   : > { %3640 = vst [vmem:[#allocation16_spill] sm:$0xff] %v2636_v32  ;;  %3641 = vst [vmem:[#allocation17_spill] sm:$0xff] %v2641_v34  ;;  %v908_v37 = vmul.f32 %v2632_v30, %v2632_v30  ;;  %v873_v38 = vmul.f32 %v2636_v32, %v2636_v32  ;;  %v909_v39 = vmul.f32 %v2641_v34, %v2641_v34  ;;  %v702_v40 = vsel %vm681_vm1, %v2636_v32, 0.0 }
 0x113   : > { %v774_v42 = vsel %vm681_vm1, %v2641_v34, 0.0  ;;  %1008 = vadd.xlane.f32.xlu0 %v2554_v41  ;;  %v2660_v43 = vadd.f32 %v702_v40, %v2626_v27  ;;  %v950_v49 = vsel %vm681_vm1, %v871_v26, 0.0  ;;  %v1022_v50 = vsel %vm681_vm1, %v907_v28, 0.0 }
 0x114   : > { %v2663_v48 = vadd.f32 %v774_v42, %v2632_v30  ;;  %v2667_v52 = vadd.f32 %v950_v49, %v870_v22  ;;  %v954_v53 = vsel %vm681_vm1, %v873_v38, 0.0  ;;  %v2670_v55 = vadd.f32 %v1022_v50, %v906_v23 }
 0x115   : > { %v1026_v56 = vsel %vm681_vm1, %v909_v39, 0.0  ;;  %696 = vadd.xlane.f32.xlu1 %v695_v2  ;;  %v2673_v41 = vadd.f32 %v954_v53, %v872_v36 }
 0x116   : > { %v2675_v60 = vadd.f32 %v1026_v56, %v908_v37  ;;  %v2677_v61 = vpop.f32.mrb[12].mxu0  ;;  %v2679_v62 = vpop.f32.mrb[12].mxu1 }
 0x117   : > { %3642 = vst [vmem:[#allocation18_spill] sm:$0xff] %v2677_v61  ;;  %3643 = vst [vmem:[#allocation19_spill] sm:$0xff] %v2679_v62  ;;  %764 = vadd.xlane.f32.xlu0 %v763_v59  ;;  %v2681_v63 = vpop.f32.mrb[13].mxu0  ;;  %v2683_v0 = vpop.f32.mrb[13].mxu1  ;;  %v874_v1 = vmul.f32 %v2677_v61, %v2677_v61  ;;  %v910_v4 = vmul.f32 %v2679_v62, %v2679_v62 }
 0x118   : > { %3644 = vst [vmem:[#allocation20_spill] sm:$0xff] %v2681_v63  ;;  %3645 = vst [vmem:[#allocation21_spill] sm:$0xff] %v2683_v0  ;;  %v875_v2 = vmul.f32 %v2681_v63, %v2681_v63  ;;  %v2691_v5 = vpop.f32.mrb[14].mxu0  ;;  %v911_v8 = vmul.f32 %v2683_v0, %v2683_v0  ;;  %v706_v59 = vsel %vm681_vm1, %v2681_v63, 0.0  ;;  %v2697_v10 = vpop.f32.mrb[14].mxu1  ;;  %v778_v22 = vsel %vm681_vm1, %v2683_v0, 0.0 }
 0x119   : > { %3646 = vst [vmem:[#allocation22_spill] sm:$0xff] %v2691_v5  ;;  %3647 = vst [vmem:[#allocation23_spill] sm:$0xff] %v2697_v10  ;;  %768 = vadd.xlane.f32.xlu1 %v767_v3  ;;  %v2701_v23 = vpop.f32.mrb[15].mxu0  ;;  %v2704_v26 = vadd.f32 %v706_v59, %v2677_v61  ;;  %v2706_v28 = vpop.f32.mrb[15].mxu1  ;;  %v2709_v29 = vadd.f32 %v778_v22, %v2679_v62  ;;  %v876_v31 = vmul.f32 %v2691_v5, %v2691_v5 }
 0x11a   : > { %3648 = vst [vmem:[#allocation24_spill] sm:$0xff] %v2701_v23  ;;  %3649 = vst [vmem:[#allocation25_spill] sm:$0xff] %v2706_v28  ;;  %v912_v36 = vmul.f32 %v2697_v10, %v2697_v10  ;;  %v877_v37 = vmul.f32 %v2701_v23, %v2701_v23  ;;  %v913_v3 = vmul.f32 %v2706_v28, %v2706_v28  ;;  %v710_v38 = vsel %vm681_vm1, %v2701_v23, 0.0 }
 0x11b   : > { %v782_v39 = vsel %vm681_vm1, %v2706_v28, 0.0  ;;  %944 = vadd.xlane.f32.xlu0 %v2602_v6  ;;  %v2725_v40 = vadd.f32 %v710_v38, %v2691_v5  ;;  %v958_v49 = vsel %vm681_vm1, %v875_v2, 0.0  ;;  %v1030_v50 = vsel %vm681_vm1, %v911_v8, 0.0 }
 0x11c   : > { %v2728_v42 = vadd.f32 %v782_v39, %v2697_v10  ;;  %v2732_v53 = vadd.f32 %v958_v49, %v874_v1  ;;  %v962_v56 = vsel %vm681_vm1, %v877_v37, 0.0  ;;  %v2735_v59 = vadd.f32 %v1030_v50, %v910_v4 }
 0x11d   : > { %v1034_v22 = vsel %vm681_vm1, %v913_v3, 0.0  ;;  %948 = vadd.xlane.f32.xlu1 %v2608_v11  ;;  %v2739_v6 = vadd.f32 %v962_v56, %v876_v31 }
 0x11e   : > { %v2741_v38 = vadd.f32 %v1034_v22, %v912_v36  ;;  %v2743_v39 = vpop.f32.mrb[16].mxu0  ;;  %v2745_v0 = vpop.f32.mrb[16].mxu1 }
 0x11f   : > { %3650 = vst [vmem:[#allocation26_spill] sm:$0xff] %v2743_v39  ;;  %3651 = vst [vmem:[#allocation27_spill] sm:$0xff] %v2745_v0  ;;  %1016 = vadd.xlane.f32.xlu0 %v2605_v9  ;;  %v2748_v1 = vpop.f32.mrb[17].mxu0  ;;  %v2750_v2 = vpop.f32.mrb[17].mxu1  ;;  %v878_v4 = vmul.f32 %v2743_v39, %v2743_v39  ;;  %v914_v11 = vmul.f32 %v2745_v0, %v2745_v0 }
 0x120   : > { %3652 = vst [vmem:[#allocation28_spill] sm:$0xff] %v2748_v1  ;;  %3653 = vst [vmem:[#allocation29_spill] sm:$0xff] %v2750_v2  ;;  %v879_v8 = vmul.f32 %v2748_v1, %v2748_v1  ;;  %v2758_v31 = vpop.f32.mrb[18].mxu0  ;;  %v915_v36 = vmul.f32 %v2750_v2, %v2750_v2  ;;  %v714_v9 = vsel %vm681_vm1, %v2748_v1, 0.0  ;;  %v2764_v37 = vpop.f32.mrb[18].mxu1  ;;  %v786_v3 = vsel %vm681_vm1, %v2750_v2, 0.0 }
 0x121   : > { %3654 = vst [vmem:[#allocation30_spill] sm:$0xff] %v2758_v31  ;;  %3655 = vst [vmem:[#allocation31_spill] sm:$0xff] %v2764_v37  ;;  %1020 = vadd.xlane.f32.xlu1 %v2610_v12  ;;  %v2769_v49 = vpop.f32.mrb[19].mxu0  ;;  %v2772_v50 = vadd.f32 %v714_v9, %v2743_v39  ;;  %v2774_v56 = vpop.f32.mrb[19].mxu1  ;;  %v2777_v22 = vadd.f32 %v786_v3, %v2745_v0  ;;  %v880_v1 = vmul.f32 %v2758_v31, %v2758_v31 }
 0x122   : > { %3656 = vst [vmem:[#allocation32_spill] sm:$0xff] %v2769_v49  ;;  %3657 = vst [vmem:[#allocation33_spill] sm:$0xff] %v2774_v56  ;;  %v916_v62 = vmul.f32 %v2764_v37, %v2764_v37  ;;  %v881_v2 = vmul.f32 %v2769_v49, %v2769_v49  ;;  %v917_v12 = vmul.f32 %v2774_v56, %v2774_v56  ;;  %v718_v9 = vsel %vm681_vm1, %v2769_v49, 0.0 }
 0x123   : > { %v790_v39 = vsel %vm681_vm1, %v2774_v56, 0.0  ;;  %700 = vadd.xlane.f32.xlu0 %v2639_v33  ;;  %v2793_v3 = vadd.f32 %v718_v9, %v2758_v31  ;;  %v966_v63 = vsel %vm681_vm1, %v879_v8, 0.0  ;;  %v1038_v61 = vsel %vm681_vm1, %v915_v36, 0.0 }
 0x124   : > { %v2796_v0 = vadd.f32 %v790_v39, %v2764_v37  ;;  %v2800_v23 = vadd.f32 %v966_v63, %v878_v4  ;;  %v970_v5 = vsel %vm681_vm1, %v881_v2, 0.0  ;;  %v2803_v49 = vadd.f32 %v1038_v61, %v914_v11 }
 0x125   : > { %v1042_v56 = vsel %vm681_vm1, %v917_v12, 0.0  ;;  %704 = vadd.xlane.f32.xlu1 %v2660_v43  ;;  %v2807_v33 = vadd.f32 %v970_v5, %v880_v1 }
 0x126   : > { %v2809_v9 = vadd.f32 %v1042_v56, %v916_v62  ;;  %v2811_v39 = vpop.f32.mrb[20].mxu0  ;;  %v2813_v37 = vpop.f32.mrb[20].mxu1 }
 0x127   : > { %3658 = vst [vmem:[#allocation34_spill] sm:$0xff] %v2811_v39  ;;  %3659 = vst [vmem:[#allocation35_spill] sm:$0xff] %v2813_v37  ;;  %772 = vadd.xlane.f32.xlu0 %v2644_v35  ;;  %v2816_v63 = vpop.f32.mrb[21].mxu0  ;;  %v2818_v4 = vpop.f32.mrb[21].mxu1  ;;  %v882_v61 = vmul.f32 %v2811_v39, %v2811_v39  ;;  %v918_v43 = vmul.f32 %v2813_v37, %v2813_v37 }
 0x128   : > { %3660 = vst [vmem:[#allocation36_spill] sm:$0xff] %v2816_v63  ;;  %3661 = vst [vmem:[#allocation37_spill] sm:$0xff] %v2818_v4  ;;  %v883_v62 = vmul.f32 %v2816_v63, %v2816_v63  ;;  %v2826_v5 = vpop.f32.mrb[22].mxu0  ;;  %v919_v1 = vmul.f32 %v2818_v4, %v2818_v4  ;;  %v722_v35 = vsel %vm681_vm1, %v2816_v63, 0.0  ;;  %v2832_v2 = vpop.f32.mrb[22].mxu1  ;;  %v794_v11 = vsel %vm681_vm1, %v2818_v4, 0.0 }
 0x129   : > { %3662 = vst [vmem:[#allocation38_spill] sm:$0xff] %v2826_v5  ;;  %3663 = vst [vmem:[#allocation39_spill] sm:$0xff] %v2832_v2  ;;  %776 = vadd.xlane.f32.xlu1 %v2663_v48  ;;  %v2837_v8 = vpop.f32.mrb[23].mxu0  ;;  %v2840_v36 = vadd.f32 %v722_v35, %v2811_v39  ;;  %v2842_v56 = vpop.f32.mrb[23].mxu1  ;;  %v2845_v12 = vadd.f32 %v794_v11, %v2813_v37  ;;  %v884_v63 = vmul.f32 %v2826_v5, %v2826_v5 }
 0x12a   : > { %3664 = vst [vmem:[#allocation40_spill] sm:$0xff] %v2837_v8  ;;  %3665 = vst [vmem:[#allocation41_spill] sm:$0xff] %v2842_v56  ;;  %v920_v31 = vmul.f32 %v2832_v2, %v2832_v2  ;;  %v885_v4 = vmul.f32 %v2837_v8, %v2837_v8  ;;  %v921_v48 = vmul.f32 %v2842_v56, %v2842_v56  ;;  %v726_v35 = vsel %vm681_vm1, %v2837_v8, 0.0 }
 0x12b   : > { %v798_v39 = vsel %vm681_vm1, %v2842_v56, 0.0  ;;  %952 = vadd.xlane.f32.xlu0 %v2667_v52  ;;  %v2861_v11 = vadd.f32 %v726_v35, %v2826_v5  ;;  %v974_v28 = vsel %vm681_vm1, %v883_v62, 0.0  ;;  %v1046_v10 = vsel %vm681_vm1, %v919_v1, 0.0 }
 0x12c   : > { %v2864_v37 = vadd.f32 %v798_v39, %v2832_v2  ;;  %v2868_v19 = vadd.f32 %v974_v28, %v882_v61  ;;  %v978_v17 = vsel %vm681_vm1, %v885_v4, 0.0  ;;  %v2871_v8 = vadd.f32 %v1046_v10, %v918_v43 }
 0x12d   : > { %v1050_v56 = vsel %vm681_vm1, %v921_v48, 0.0  ;;  %956 = vadd.xlane.f32.xlu1 %v2673_v41  ;;  %v2875_v52 = vadd.f32 %v978_v17, %v884_v63 }
 0x12e   : > { %v2877_v35 = vadd.f32 %v1050_v56, %v920_v31  ;;  %v2879_v39 = vpop.f32.mrb[24].mxu0  ;;  %v2881_v2 = vpop.f32.mrb[24].mxu1 }
 0x12f   : > { %3666 = vst [vmem:[#allocation42_spill] sm:$0xff] %v2879_v39  ;;  %3667 = vst [vmem:[#allocation43_spill] sm:$0xff] %v2881_v2  ;;  %1024 = vadd.xlane.f32.xlu0 %v2670_v55  ;;  %v2884_v28 = vpop.f32.mrb[25].mxu0  ;;  %v2886_v61 = vpop.f32.mrb[25].mxu1  ;;  %v886_v10 = vmul.f32 %v2879_v39, %v2879_v39  ;;  %v922_v41 = vmul.f32 %v2881_v2, %v2881_v2 }
 0x130   : > { %3668 = vst [vmem:[#allocation44_spill] sm:$0xff] %v2884_v28  ;;  %3669 = vst [vmem:[#allocation45_spill] sm:$0xff] %v2886_v61  ;;  %v887_v17 = vmul.f32 %v2884_v28, %v2884_v28  ;;  %v2894_v31 = vpop.f32.mrb[26].mxu0  ;;  %v923_v63 = vmul.f32 %v2886_v61, %v2886_v61  ;;  %v730_v55 = vsel %vm681_vm1, %v2884_v28, 0.0  ;;  %v2900_v4 = vpop.f32.mrb[26].mxu1  ;;  %v802_v43 = vsel %vm681_vm1, %v2886_v61, 0.0 }
 0x131   : > { %3670 = vst [vmem:[#allocation46_spill] sm:$0xff] %v2894_v31  ;;  %3671 = vst [vmem:[#allocation47_spill] sm:$0xff] %v2900_v4  ;;  %1028 = vadd.xlane.f32.xlu1 %v2675_v60  ;;  %v2905_v62 = vpop.f32.mrb[27].mxu0  ;;  %v2908_v1 = vadd.f32 %v730_v55, %v2879_v39  ;;  %v2910_v56 = vpop.f32.mrb[27].mxu1  ;;  %v2913_v48 = vadd.f32 %v802_v43, %v2881_v2  ;;  %v888_v28 = vmul.f32 %v2894_v31, %v2894_v31 }
 0x132   : > { %3672 = vst [vmem:[#allocation48_spill] sm:$0xff] %v2905_v62  ;;  %3673 = vst [vmem:[#allocation49_spill] sm:$0xff] %v2910_v56  ;;  %v924_v5 = vmul.f32 %v2900_v4, %v2900_v4  ;;  %v889_v61 = vmul.f32 %v2905_v62, %v2905_v62  ;;  %v925_v60 = vmul.f32 %v2910_v56, %v2910_v56  ;;  %v734_v55 = vsel %vm681_vm1, %v2905_v62, 0.0 }
 0x133   : > { %v806_v39 = vsel %vm681_vm1, %v2910_v56, 0.0  ;;  %708 = vadd.xlane.f32.xlu0 %v2704_v26  ;;  %v2929_v43 = vadd.f32 %v734_v55, %v2894_v31  ;;  %v982_v18 = vsel %vm681_vm1, %v887_v17, 0.0  ;;  %v1054_v7 = vsel %vm681_vm1, %v923_v63, 0.0 }
 0x134   : > { %v2932_v2 = vadd.f32 %v806_v39, %v2900_v4  ;;  %v2936_v32 = vadd.f32 %v982_v18, %v886_v10  ;;  %v986_v27 = vsel %vm681_vm1, %v889_v61, 0.0  ;;  %v2939_v62 = vadd.f32 %v1054_v7, %v922_v41 }
 0x135   : > { %v1058_v56 = vsel %vm681_vm1, %v925_v60, 0.0  ;;  %712 = vadd.xlane.f32.xlu1 %v2725_v40  ;;  %v2943_v26 = vadd.f32 %v986_v27, %v888_v28 }
 0x136   : > { %v2945_v55 = vadd.f32 %v1058_v56, %v924_v5  ;;  %v2947_v39 = vpop.f32.mrb[28].mxu0  ;;  %v2949_v4 = vpop.f32.mrb[28].mxu1 }
 0x137   : > { %3674 = vst [vmem:[#allocation50_spill] sm:$0xff] %v2947_v39  ;;  %3675 = vst [vmem:[#allocation51_spill] sm:$0xff] %v2949_v4  ;;  %780 = vadd.xlane.f32.xlu0 %v2709_v29  ;;  %v2952_v18 = vpop.f32.mrb[29].mxu0  ;;  %v2954_v10 = vpop.f32.mrb[29].mxu1  ;;  %v890_v7 = vmul.f32 %v2947_v39, %v2947_v39  ;;  %v926_v40 = vmul.f32 %v2949_v4, %v2949_v4 }
 0x138   : > { %3676 = vst [vmem:[#allocation52_spill] sm:$0xff] %v2952_v18  ;;  %3677 = vst [vmem:[#allocation53_spill] sm:$0xff] %v2954_v10  ;;  %v891_v27 = vmul.f32 %v2952_v18, %v2952_v18  ;;  %v2962_v5 = vpop.f32.mrb[30].mxu0  ;;  %v927_v28 = vmul.f32 %v2954_v10, %v2954_v10  ;;  %v738_v29 = vsel %vm681_vm1, %v2952_v18, 0.0  ;;  %v2968_v61 = vpop.f32.mrb[30].mxu1  ;;  %v810_v41 = vsel %vm681_vm1, %v2954_v10, 0.0 }
 0x139   : > { %3678 = vst [vmem:[#allocation54_spill] sm:$0xff] %v2962_v5  ;;  %3679 = vst [vmem:[#allocation55_spill] sm:$0xff] %v2968_v61  ;;  %784 = vadd.xlane.f32.xlu1 %v2728_v42  ;;  %v2973_v17 = vpop.f32.mrb[31].mxu0  ;;  %v2976_v63 = vadd.f32 %v738_v29, %v2947_v39  ;;  %v2978_v56 = vpop.f32.mrb[31].mxu1  ;;  %v2981_v60 = vadd.f32 %v810_v41, %v2949_v4  ;;  %v892_v18 = vmul.f32 %v2962_v5, %v2962_v5 }
 0x13a   : > { %3680 = vst [vmem:[#allocation56_spill] sm:$0xff] %v2973_v17  ;;  %3681 = vst [vmem:[#allocation57_spill] sm:$0xff] %v2978_v56  ;;  %v928_v31 = vmul.f32 %v2968_v61, %v2968_v61  ;;  %v893_v10 = vmul.f32 %v2973_v17, %v2973_v17  ;;  %v929_v42 = vmul.f32 %v2978_v56, %v2978_v56  ;;  %v742_v29 = vsel %vm681_vm1, %v2973_v17, 0.0 }
 0x13b   : > { %v814_v39 = vsel %vm681_vm1, %v2978_v56, 0.0  ;;  %960 = vadd.xlane.f32.xlu0 %v2732_v53  ;;  %v2997_v41 = vadd.f32 %v742_v29, %v2962_v5  ;;  %v990_v34 = vsel %vm681_vm1, %v891_v27, 0.0  ;;  %v1062_v30 = vsel %vm681_vm1, %v927_v28, 0.0 }
 0x13c   : > { %v3000_v4 = vadd.f32 %v814_v39, %v2968_v61  ;;  %v3004_v47 = vadd.f32 %v990_v34, %v890_v7  ;;  %v994_v45 = vsel %vm681_vm1, %v893_v10, 0.0  ;;  %v3007_v17 = vadd.f32 %v1062_v30, %v926_v40 }
 0x13d   : > { %v1066_v56 = vsel %vm681_vm1, %v929_v42, 0.0  ;;  %964 = vadd.xlane.f32.xlu1 %v2739_v6  ;;  %v3011_v53 = vadd.f32 %v994_v45, %v892_v18 }
 0x13e   : > { %v3013_v29 = vadd.f32 %v1066_v56, %v928_v31  ;;  %v3015_v39 = vpop.f32.mrb[32].mxu0  ;;  %v3017_v61 = vpop.f32.mrb[32].mxu1 }
 0x13f   : > { %3682 = vst [vmem:[#allocation58_spill] sm:$0xff] %v3015_v39  ;;  %3683 = vst [vmem:[#allocation59_spill] sm:$0xff] %v3017_v61  ;;  %1032 = vadd.xlane.f32.xlu0 %v2735_v59  ;;  %v3020_v34 = vpop.f32.mrb[33].mxu0  ;;  %v3022_v7 = vpop.f32.mrb[33].mxu1  ;;  %v894_v30 = vmul.f32 %v3015_v39, %v3015_v39  ;;  %v930_v6 = vmul.f32 %v3017_v61, %v3017_v61 }
 0x140   : > { %3684 = vst [vmem:[#allocation60_spill] sm:$0xff] %v3020_v34  ;;  %3685 = vst [vmem:[#allocation61_spill] sm:$0xff] %v3022_v7  ;;  %v895_v45 = vmul.f32 %v3020_v34, %v3020_v34  ;;  %v3030_v31 = vpop.f32.mrb[34].mxu0  ;;  %v931_v18 = vmul.f32 %v3022_v7, %v3022_v7  ;;  %v746_v59 = vsel %vm681_vm1, %v3020_v34, 0.0  ;;  %v3036_v10 = vpop.f32.mrb[34].mxu1  ;;  %v818_v40 = vsel %vm681_vm1, %v3022_v7, 0.0 }
 0x141   : > { %1036 = vadd.xlane.f32.xlu1 %v2741_v38  ;;  %v3041_v27 = vpop.f32.mrb[35].mxu0  ;;  %v747_v28 = vadd.f32 %v746_v59, %v3015_v39  ;;  %v3044_v56 = vpop.f32.mrb[35].mxu1  ;;  %v819_v42 = vadd.f32 %v818_v40, %v3017_v61  ;;  %v896_v5 = vmul.f32 %v3030_v31, %v3030_v31  ;;  %v932_v34 = vmul.f32 %v3036_v10, %v3036_v10 }
 0x142   : > { %3686 = vst [vmem:[#allocation62_spill] sm:$0xff] %v3041_v27  ;;  %3687 = vst [vmem:[#allocation63_spill] sm:$0xff] %v3044_v56  ;;  %v750_v46 = vsel %vm681_vm1, %v3041_v27, 0.0  ;;  %v897_v38 = vmul.f32 %v3041_v27, %v3041_v27  ;;  %v822_v7 = vsel %vm681_vm1, %v3044_v56, 0.0  ;;  %v933_v59 = vmul.f32 %v3044_v56, %v3044_v56 }
 0x143   : > { %716 = vadd.xlane.f32.xlu0 %v2772_v50  ;;  %v751_v40 = vadd.f32 %v750_v46, %v3030_v31  ;;  %v823_v61 = vadd.f32 %v822_v7, %v3036_v10  ;;  %v998_v39 = vsel %vm681_vm1, %v895_v45, 0.0  ;;  %v1070_v44 = vsel %vm681_vm1, %v931_v18, 0.0 }
 0x144   : > { %v999_v57 = vadd.f32 %v998_v39, %v894_v30  ;;  %v1002_v51 = vsel %vm681_vm1, %v897_v38, 0.0  ;;  %v1071_v27 = vadd.f32 %v1070_v44, %v930_v6  ;;  %v1074_v58 = vsel %vm681_vm1, %v933_v59, 0.0  ;;  %v1258_v6 = vld [vmem:[%s3121_s6] sm:$0xff] }
 0x145   : > { %720 = vadd.xlane.f32.xlu1 %v2793_v3  ;;  %v1003_v54 = vadd.f32 %v1002_v51, %v896_v5  ;;  %v1075_v56 = vadd.f32 %v1074_v58, %v932_v34  ;;  %v1259_v34 = vld [vmem:[%s3121_s6 + $0x8] sm:$0xff] }
 0x147   : > { %788 = vadd.xlane.f32.xlu0 %v2777_v22 }
 0x149   : > { %792 = vadd.xlane.f32.xlu1 %v2796_v0 }
 0x14b   : > { %968 = vadd.xlane.f32.xlu0 %v2800_v23 }
 0x14d   : > { %972 = vadd.xlane.f32.xlu1 %v2807_v33 }
 0x14f   : > { %1040 = vadd.xlane.f32.xlu0 %v2803_v49 }
 0x151   : > { %1044 = vadd.xlane.f32.xlu1 %v2809_v9 }
 0x153   : > { %724 = vadd.xlane.f32.xlu0 %v2840_v36 }
 0x155   : > { %728 = vadd.xlane.f32.xlu1 %v2861_v11 }
 0x157   : > { %796 = vadd.xlane.f32.xlu0 %v2845_v12 }
 0x159   : > { %800 = vadd.xlane.f32.xlu1 %v2864_v37 }
 0x15b   : > { %976 = vadd.xlane.f32.xlu0 %v2868_v19 }
 0x15d   : > { %980 = vadd.xlane.f32.xlu1 %v2875_v52 }
 0x15f   : > { %1048 = vadd.xlane.f32.xlu0 %v2871_v8 }
 0x161   : > { %1052 = vadd.xlane.f32.xlu1 %v2877_v35 }
 0x163   : > { %732 = vadd.xlane.f32.xlu0 %v2908_v1 }
 0x165   : > { %736 = vadd.xlane.f32.xlu1 %v2929_v43 }
 0x167   : > { %804 = vadd.xlane.f32.xlu0 %v2913_v48 }
 0x169   : > { %808 = vadd.xlane.f32.xlu1 %v2932_v2 }
 0x16b   : > { %984 = vadd.xlane.f32.xlu0 %v2936_v32 }
 0x16d   : > { %988 = vadd.xlane.f32.xlu1 %v2943_v26 }
 0x16f   : > { %1056 = vadd.xlane.f32.xlu0 %v2939_v62 }
 0x171   : > { %1060 = vadd.xlane.f32.xlu1 %v2945_v55 }
 0x173   : > { %740 = vadd.xlane.f32.xlu0 %v2976_v63 }
 0x175   : > { %744 = vadd.xlane.f32.xlu1 %v2997_v41 }
 0x177   : > { %812 = vadd.xlane.f32.xlu0 %v2981_v60 }
 0x179   : > { %816 = vadd.xlane.f32.xlu1 %v3000_v4 }
 0x17b   : > { %992 = vadd.xlane.f32.xlu0 %v3004_v47 }
 0x17d   : > { %996 = vadd.xlane.f32.xlu1 %v3011_v53 }
 0x17f   : > { %1064 = vadd.xlane.f32.xlu0 %v3007_v17 }
 0x181   : > { %1068 = vadd.xlane.f32.xlu1 %v3013_v29 }
 0x183   : > { %748 = vadd.xlane.f32.xlu0 %v747_v28 }
 0x185   : > { %752 = vadd.xlane.f32.xlu1 %v751_v40 }
 0x187   : > { %820 = vadd.xlane.f32.xlu0 %v819_v42 }
 0x189   : > { %824 = vadd.xlane.f32.xlu1 %v823_v61 }
 0x18b   : > { %1000 = vadd.xlane.f32.xlu0 %v999_v57 }
 0x18d   : > { %1004 = vadd.xlane.f32.xlu1 %v1003_v54 }
 0x18f   : > { %1072 = vadd.xlane.f32.xlu0 %v1071_v27 }
 0x190   : > { %v685_v44 = vpop.xlane.xlu0 %684 }
 0x191   : > { %1076 = vadd.xlane.f32.xlu1 %v1075_v56  ;;  %v3099_v32 = vmul.f32 0.0051020407, %v685_v44 }
 0x192   : > { %v761_v46 = vpop.xlane.xlu1 %760 }
 0x193   : > { %v3097_v19 = vmul.f32 0.0051020407, %v761_v46  ;;  %v1114_v3 = vmul.f32 %v3099_v32, %v3099_v32 }
 0x194   : > { %v757_v51 = vpop.xlane.xlu0 %756 }
 0x195   : > { %v1133_v37 = vmul.f32 %v3097_v19, %v3097_v19  ;;  %v3107_v50 = vmul.f32 0.0051020407, %v757_v51 }
 0x196   : > { %v941_v58 = vpop.xlane.xlu1 %940 }
 0x197   : > { %v1079_v49 = vmul.f32 0.0051020407, %v941_v58  ;;  %v1132_v11 = vmul.f32 %v3107_v50, %v3107_v50 }
 0x198   : > { %v689_v47 = vpop.xlane.xlu0 %688 }
 0x199   : > { %v3101_v0 = vmul.f32 0.0051020407, %v689_v47  ;;  %v1277_v47 = vld [vmem:[%s3121_s6 + $0x98] sm:$0xff] }
 0x19a   : > { %v1013_v23 = vpop.xlane.xlu1 %1012 }
 0x19b   : > { %v1115_v54 = vmul.f32 %v3101_v0, %v3101_v0  ;;  %v1097_v57 = vmul.f32 0.0051020407, %v1013_v23  ;;  %v1276_v23 = vld [vmem:[%s3121_s6 + $0x90] sm:$0xff] }
 0x19c   : > { %v937_v22 = vpop.xlane.xlu0 %936 }
 0x19d   : > { %v1151_v33 = vsub.f32 %v1079_v49, %v1115_v54  ;;  %v1169_v9 = vsub.f32 %v1097_v57, %v1133_v37  ;;  %v1078_v2 = vmul.f32 0.0051020407, %v937_v22 }
 0x19e   : > { %v693_v8 = vpop.xlane.xlu1 %692 }
 0x19f   : > { %v1187_v36 = vadd.f32 1e-05, %v1151_v33  ;;  %v1150_v12 = vsub.f32 %v1078_v2, %v1114_v3  ;;  %v1205_v35 = vadd.f32 1e-05, %v1169_v9  ;;  %v3113_v43 = vmul.f32 0.0051020407, %v693_v8 }
 0x1a0   : > { %v1009_v52 = vpop.xlane.xlu0 %1008 }
 0x1a1   : > { %2150 = vrsqrt.f32 %v1187_v36  ;;  %v1186_v4 = vadd.f32 1e-05, %v1150_v12  ;;  %v1096_v62 = vmul.f32 0.0051020407, %v1009_v52  ;;  %v1116_v17 = vmul.f32 %v3113_v43, %v3113_v43  ;;  %v1331_v36 = vld [vmem:[%s3143_s19 + $0x8] sm:$0xff] }
 0x1a2   : > { %v697_v1 = vpop.xlane.xlu1 %696 }
 0x1a3   : > { %2152 = vrsqrt.f32 %v1186_v4  ;;  %v1168_v48 = vsub.f32 %v1096_v62, %v1132_v11  ;;  %v3115_v5 = vmul.f32 0.0051020407, %v697_v1  ;;  %v1349_v1 = vld [vmem:[%s3143_s19 + $0x98] sm:$0xff] }
 0x1a4   : > { %v765_v26 = vpop.xlane.xlu0 %764  ;;  %2154 = vrsqrt.f32 %v1205_v35 }
 0x1a5   : > { %v1204_v55 = vadd.f32 1e-05, %v1168_v48  ;;  %v1117_v60 = vmul.f32 %v3115_v5, %v3115_v5  ;;  %v3127_v41 = vmul.f32 0.0051020407, %v765_v26  ;;  %v1330_v48 = vld [vmem:[%s3143_s19] sm:$0xff] }
 0x1a6   : > { %v769_v61 = vpop.xlane.xlu1 %768 }
 0x1a7   : > { %2156 = vrsqrt.f32 %v1204_v55  ;;  %v3130_v7 = vmul.f32 0.0051020407, %v769_v61  ;;  %v1134_v28 = vmul.f32 %v3127_v41, %v3127_v41 }
 0x1a8   : > { %v945_v63 = vpop.xlane.xlu0 %944 }
 0x1a9   : > { %v1080_v53 = vmul.f32 0.0051020407, %v945_v63  ;;  %v1135_v46 = vmul.f32 %v3130_v7, %v3130_v7  ;;  %v1261_v63 = vld [vmem:[%s3121_s6 + $0x18] sm:$0xff] }
 0x1aa   : > { %v949_v29 = vpop.xlane.xlu1 %948 }
 0x1ab   : > { %v2151_v39 = vpop.eup %2150  ;;  %v1081_v30 = vmul.f32 0.0051020407, %v949_v29  ;;  %v1152_v45 = vsub.f32 %v1080_v53, %v1116_v17 }
 0x1ac   : > { %v1017_v18 = vpop.xlane.xlu0 %1016  ;;  %v1295_v38 = vmul.f32 %v2151_v39, %v1259_v34  ;;  %v1348_v34 = vld [vmem:[%s3143_s19 + $0x90] sm:$0xff] }
 0x1ad   : > { %v2153_v27 = vpop.eup %2152  ;;  %v1153_v56 = vsub.f32 %v1081_v30, %v1117_v60  ;;  %v1098_v42 = vmul.f32 0.0051020407, %v1017_v18  ;;  %v1188_v37 = vadd.f32 1e-05, %v1152_v45 }
 0x1ae   : > { %v1021_v59 = vpop.xlane.xlu1 %1020  ;;  %v1294_v40 = vmul.f32 %v2153_v27, %v1258_v6  ;;  %v2155_v44 = vpop.eup %2154  ;;  %v1367_v3 = vmul.f32 %v1295_v38, %v3101_v0 }
 0x1af   : > { %v1189_v51 = vadd.f32 1e-05, %v1153_v56  ;;  %v1099_v58 = vmul.f32 0.0051020407, %v1021_v59  ;;  %v1170_v57 = vsub.f32 %v1098_v42, %v1134_v28  ;;  %v1313_v9 = vmul.f32 %v2155_v44, %v1277_v47  ;;  %v1279_v42 = vld [vmem:[%s3121_s6 + $0xa8] sm:$0xff] }
 0x1b0   : > { %v701_v49 = vpop.xlane.xlu0 %700  ;;  %1440 = vperm.xlu0 %2148, %v1294_v40   ;;  %v1403_v4 = vsub.f32 %v1331_v36, %v1367_v3  ;;  %v1366_v62 = vmul.f32 %v1294_v40, %v3099_v32 }
 0x1b1   : > { %v2157_v54 = vpop.eup %2156  ;;  %2158 = vrsqrt.f32 %v1189_v51  ;;  %v1171_v22 = vsub.f32 %v1099_v58, %v1135_v46  ;;  %v1206_v11 = vadd.f32 1e-05, %v1170_v57  ;;  %v1385_v0 = vmul.f32 %v1313_v9, %v3097_v19  ;;  %v1260_v51 = vld [vmem:[%s3121_s6 + $0x10] sm:$0xff] }
 0x1b2   : > { %v705_v33 = vpop.xlane.xlu1 %704  ;;  %v1312_v2 = vmul.f32 %v2157_v54, %v1276_v23  ;;  %2160 = vrsqrt.f32 %v1188_v37  ;;  %v3153_v55 = vmul.f32 0.0051020407, %v701_v49  ;;  %v1402_v53 = vsub.f32 %v1330_v48, %v1366_v62 }
 0x1b3   : > { %v1207_v8 = vadd.f32 1e-05, %v1171_v22  ;;  %v3147_v52 = vmul.f32 0.0051020407, %v705_v33  ;;  %v1421_v19 = vsub.f32 %v1349_v1, %v1385_v0  ;;  %v1333_v22 = vld [vmem:[%s3143_s19 + $0x18] sm:$0xff]  ;;  %v1351_v0 = vld [vmem:[%s3143_s19 + $0xa8] sm:$0xff] }
 0x1b4   : > { %v773_v12 = vpop.xlane.xlu0 %772  ;;  %1535 = vperm.xlu0 %2148, %v1313_v9   ;;  %1530 = vperm.xlu1 %2149, %v1312_v2   ;;  %v1384_v32 = vmul.f32 %v1312_v2, %v3107_v50  ;;  %v1118_v18 = vmul.f32 %v3153_v55, %v3153_v55 }
 0x1b5   : > { %2162 = vrsqrt.f32 %v1207_v8  ;;  %v1119_v61 = vmul.f32 %v3147_v52, %v3147_v52  ;;  %v3162_v30 = vmul.f32 0.0051020407, %v773_v12  ;;  %v1278_v8 = vld [vmem:[%s3121_s6 + $0xa0] sm:$0xff] }
 0x1b6   : > { %v777_v35 = vpop.xlane.xlu1 %776  ;;  %2164 = vrsqrt.f32 %v1206_v11  ;;  %v1420_v59 = vsub.f32 %v1348_v34, %v1384_v32 }
 0x1b7   : > { %v3157_v17 = vmul.f32 0.0051020407, %v777_v35  ;;  %v1136_v58 = vmul.f32 %v3162_v30, %v3162_v30 }
 0x1b8   : > { %v953_v26 = vpop.xlane.xlu0 %952  ;;  %1697 = vperm.xlu0 %2148, %v1403_v4   ;;  %1445 = vperm.xlu1 %2149, %v1295_v38  }
 0x1b9   : > { %v1137_v27 = vmul.f32 %v3157_v17, %v3157_v17  ;;  %v1082_v28 = vmul.f32 0.0051020407, %v953_v26 }
 0x1ba   : > { %v957_v60 = vpop.xlane.xlu1 %956 }
 0x1bb   : > { %v2159_v29 = vpop.eup %2158  ;;  %v1083_v39 = vmul.f32 0.0051020407, %v957_v60  ;;  %v1154_v49 = vsub.f32 %v1082_v28, %v1118_v18  ;;  %v1263_v60 = vld [vmem:[%s3121_s6 + $0x28] sm:$0xff] }
 0x1bc   : > { %v1025_v6 = vpop.xlane.xlu0 %1024  ;;  %1787 = vperm.xlu0 %2148, %v1421_v19   ;;  %1692 = vperm.xlu1 %2149, %v1402_v53   ;;  %v1297_v45 = vmul.f32 %v2159_v29, %v1261_v63  ;;  %v2161_v50 = vpop.eup %2160 }
 0x1bd   : > { %v1155_v56 = vsub.f32 %v1083_v39, %v1119_v61  ;;  %v1100_v54 = vmul.f32 0.0051020407, %v1025_v6  ;;  %v1296_v33 = vmul.f32 %v2161_v50, %v1260_v51  ;;  %v1190_v35 = vadd.f32 1e-05, %v1154_v49  ;;  %v1332_v39 = vld [vmem:[%s3143_s19 + $0x10] sm:$0xff] }
 0x1be   : > { %v1029_v38 = vpop.xlane.xlu1 %1028  ;;  %v1369_v37 = vmul.f32 %v1297_v45, %v3115_v5 }
 0x1bf   : > { %v2163_v40 = vpop.eup %2162  ;;  %v1191_v44 = vadd.f32 1e-05, %v1155_v56  ;;  %v1101_v46 = vmul.f32 0.0051020407, %v1029_v38  ;;  %v1172_v5 = vsub.f32 %v1100_v54, %v1136_v58  ;;  %v1368_v53 = vmul.f32 %v1296_v33, %v3113_v43  ;;  %v1281_v56 = vld [vmem:[%s3121_s6 + $0xb8] sm:$0xff] }
 0x1c0   : > { %v709_v47 = vpop.xlane.xlu0 %708  ;;  %1782 = vperm.xlu1 %2149, %v1420_v59   ;;  %v1315_v23 = vmul.f32 %v2163_v40, %v1279_v42  ;;  %v2165_v9 = vpop.eup %2164  ;;  %v1405_v12 = vsub.f32 %v1333_v22, %v1369_v37 }
 0x1c1   : > { %2166 = vrsqrt.f32 %v1191_v44  ;;  %v1173_v57 = vsub.f32 %v1101_v46, %v1137_v27  ;;  %v1314_v1 = vmul.f32 %v2165_v9, %v1278_v8  ;;  %v1208_v61 = vadd.f32 1e-05, %v1172_v5  ;;  %v1350_v44 = vld [vmem:[%s3143_s19 + $0xa0] sm:$0xff] }
 0x1c2   : > { %v713_v3 = vpop.xlane.xlu1 %712  ;;  %1545 = vperm.xlu0 %2148, %v1315_v23   ;;  %v1387_v11 = vmul.f32 %v1315_v23, %v3130_v7  ;;  %v3188_v18 = vmul.f32 0.0051020407, %v709_v47  ;;  %v1404_v50 = vsub.f32 %v1332_v39, %v1368_v53 }
 0x1c3   : > { %v1209_v2 = vadd.f32 1e-05, %v1173_v57  ;;  %v3176_v4 = vmul.f32 0.0051020407, %v713_v3  ;;  %v1386_v43 = vmul.f32 %v1314_v1, %v3127_v41  ;;  %v1335_v41 = vld [vmem:[%s3143_s19 + $0x28] sm:$0xff]  ;;  %v1262_v3 = vld [vmem:[%s3121_s6 + $0x20] sm:$0xff] }
 0x1c4   : > { %v781_v36 = vpop.xlane.xlu0 %780  ;;  %1450 = vperm.xlu1 %2149, %v1296_v33   ;;  %v1423_v26 = vsub.f32 %v1351_v0, %v1387_v11  ;;  %v1120_v47 = vmul.f32 %v3188_v18, %v3188_v18  ;;  %v1353_v11 = vld [vmem:[%s3143_s19 + $0xb8] sm:$0xff] }
 0x1c5   : > { %2168 = vrsqrt.f32 %v1209_v2  ;;  %v1121_v63 = vmul.f32 %v3176_v4, %v3176_v4  ;;  %v1422_v54 = vsub.f32 %v1350_v44, %v1386_v43  ;;  %v1334_v44 = vld [vmem:[%s3143_s19 + $0x20] sm:$0xff] }
 0x1c6   : > { %v785_v62 = vpop.xlane.xlu1 %784  ;;  %1707 = vperm.xlu0 %2148, %v1405_v12   ;;  %2170 = vrsqrt.f32 %v1190_v35 }
 0x1c7   : > { %v3181_v7 = vmul.f32 0.0051020407, %v785_v62  ;;  %2172 = vrsqrt.f32 %v1208_v61  ;;  %v1280_v62 = vld [vmem:[%s3121_s6 + $0xb0] sm:$0xff] }
 0x1c8   : > { %v961_v48 = vpop.xlane.xlu0 %960  ;;  %1540 = vperm.xlu1 %2149, %v1314_v1  }
 0x1c9   : > { %v1139_v27 = vmul.f32 %v3181_v7, %v3181_v7  ;;  %v1084_v23 = vmul.f32 0.0051020407, %v961_v48 }
 0x1ca   : > { %v965_v19 = vpop.xlane.xlu1 %964  ;;  %1797 = vperm.xlu0 %2148, %v1423_v26  }
 0x1cb   : > { %v2167_v32 = vpop.eup %2166  ;;  %v1085_v29 = vmul.f32 0.0051020407, %v965_v19 }
 0x1cc   : > { %v1033_v34 = vpop.xlane.xlu0 %1032  ;;  %1455 = vperm.xlu1 %2149, %v1297_v45   ;;  %v3186_v6 = vmul.f32 %v2167_v32, %v1263_v60  ;;  %v3195_v45 = vmul.f32 0.0051020407, %v781_v36  ;;  %v1156_v36 = vsub.f32 %v1084_v23, %v1120_v47  ;;  %v1265_v60 = vld [vmem:[%s3121_s6 + $0x38] sm:$0xff] }
 0x1cd   : > { %v1157_v28 = vsub.f32 %v1085_v29, %v1121_v63  ;;  %v1102_v9 = vmul.f32 0.0051020407, %v1033_v34 }
 0x1ce   : > { %v1037_v42 = vpop.xlane.xlu1 %1036  ;;  %v1371_v58 = vmul.f32 %v3186_v6, %v3147_v52  ;;  %v1138_v33 = vmul.f32 %v3195_v45, %v3195_v45  ;;  %v1192_v61 = vadd.f32 1e-05, %v1156_v36 }
 0x1cf   : > { %v2169_v38 = vpop.eup %2168  ;;  %v1193_v59 = vadd.f32 1e-05, %v1157_v28  ;;  %v1103_v40 = vmul.f32 0.0051020407, %v1037_v42  ;;  %v1283_v42 = vld [vmem:[%s3121_s6 + $0xc8] sm:$0xff] }
 0x1d0   : > { %v717_v46 = vpop.xlane.xlu0 %716  ;;  %1702 = vperm.xlu1 %2149, %v1404_v50   ;;  %v1317_v51 = vmul.f32 %v2169_v38, %v1281_v56  ;;  %v2171_v57 = vpop.eup %2170  ;;  %v1407_v2 = vsub.f32 %v1335_v41, %v1371_v58  ;;  %v1174_v1 = vsub.f32 %v1102_v9, %v1138_v33  ;;  %v1337_v41 = vld [vmem:[%s3143_s19 + $0x38] sm:$0xff] }
 0x1d1   : > { %2174 = vrsqrt.f32 %v1193_v59  ;;  %v1175_v37 = vsub.f32 %v1103_v40, %v1139_v27  ;;  %v1298_v5 = vmul.f32 %v2171_v57, %v1262_v3  ;;  %v2173_v0 = vpop.eup %2172 }
 0x1d2   : > { %v721_v49 = vpop.xlane.xlu1 %720  ;;  %1555 = vperm.xlu0 %2148, %v1317_v51   ;;  %v1389_v8 = vmul.f32 %v1317_v51, %v3157_v17  ;;  %v1316_v53 = vmul.f32 %v2173_v0, %v1280_v62  ;;  %v1210_v39 = vadd.f32 1e-05, %v1174_v1  ;;  %v3222_v51 = vmul.f32 0.0051020407, %v717_v46 }
 0x1d3   : > { %v1211_v22 = vadd.f32 1e-05, %v1175_v37  ;;  %v3206_v12 = vmul.f32 0.0051020407, %v721_v49  ;;  %v1370_v43 = vmul.f32 %v1298_v5, %v3153_v55 }
 0x1d4   : > { %v789_v52 = vpop.xlane.xlu0 %788  ;;  %1792 = vperm.xlu1 %2149, %v1422_v54   ;;  %v1425_v26 = vsub.f32 %v1353_v11, %v1389_v8  ;;  %v1388_v55 = vmul.f32 %v1316_v53, %v3162_v30 }
 0x1d5   : > { %2176 = vrsqrt.f32 %v1211_v22  ;;  %v1123_v17 = vmul.f32 %v3206_v12, %v3206_v12  ;;  %v1406_v54 = vsub.f32 %v1334_v44, %v1370_v43  ;;  %v3229_v57 = vmul.f32 0.0051020407, %v789_v52  ;;  %v1352_v22 = vld [vmem:[%s3143_s19 + $0xb0] sm:$0xff] }
 0x1d6   : > { %v793_v35 = vpop.xlane.xlu1 %792  ;;  %1717 = vperm.xlu0 %2148, %v1407_v2   ;;  %2178 = vrsqrt.f32 %v1192_v61  ;;  %v1355_v2 = vld [vmem:[%s3143_s19 + $0xc8] sm:$0xff]  ;;  %v1424_v52 = vsub.f32 %v1352_v22, %v1388_v55 }
 0x1d7   : > { %v3212_v63 = vmul.f32 0.0051020407, %v793_v35  ;;  %2180 = vrsqrt.f32 %v1210_v39  ;;  %v1140_v11 = vmul.f32 %v3229_v57, %v3229_v57 }
 0x1d8   : > { %v969_v48 = vpop.xlane.xlu0 %968  ;;  %1460 = vperm.xlu1 %2149, %v1298_v5   ;;  %v1264_v5 = vld [vmem:[%s3121_s6 + $0x30] sm:$0xff] }
 0x1d9   : > { %v1141_v28 = vmul.f32 %v3212_v63, %v3212_v63  ;;  %v1086_v3 = vmul.f32 0.0051020407, %v969_v48 }
 0x1da   : > { %v973_v19 = vpop.xlane.xlu1 %972  ;;  %1807 = vperm.xlu0 %2148, %v1425_v26   ;;  %v1267_v26 = vld [vmem:[%s3121_s6 + $0x48] sm:$0xff] }
 0x1db   : > { %v2175_v32 = vpop.eup %2174  ;;  %v1087_v29 = vmul.f32 0.0051020407, %v973_v19 }
 0x1dc   : > { %v1041_v34 = vpop.xlane.xlu0 %1040  ;;  %1550 = vperm.xlu1 %2149, %v1316_v53   ;;  %v3215_v27 = vmul.f32 %v2175_v32, %v1265_v60 }
 0x1dd   : > { %v1159_v56 = vsub.f32 %v1087_v29, %v1123_v17  ;;  %v1104_v35 = vmul.f32 0.0051020407, %v1041_v34  ;;  %v1282_v29 = vld [vmem:[%s3121_s6 + $0xc0] sm:$0xff] }
 0x1de   : > { %v1045_v50 = vpop.xlane.xlu1 %1044  ;;  %v1373_v23 = vmul.f32 %v3215_v27, %v3176_v4 }
 0x1df   : > { %v2177_v38 = vpop.eup %2176  ;;  %v1195_v59 = vadd.f32 1e-05, %v1159_v56  ;;  %v1105_v40 = vmul.f32 0.0051020407, %v1045_v50  ;;  %v1176_v53 = vsub.f32 %v1104_v35, %v1140_v11  ;;  %v1285_v50 = vld [vmem:[%s3121_s6 + $0xd8] sm:$0xff] }
 0x1e0   : > { %v725_v58 = vpop.xlane.xlu0 %724  ;;  %1465 = vperm.xlu1 %2149, %v3186_v6   ;;  %v1319_v47 = vmul.f32 %v2177_v38, %v1283_v42  ;;  %v1122_v6 = vmul.f32 %v3222_v51, %v3222_v51  ;;  %v1409_v4 = vsub.f32 %v1337_v41, %v1373_v23  ;;  %v2179_v36 = vpop.eup %2178 }
 0x1e1   : > { %2182 = vrsqrt.f32 %v1195_v59  ;;  %v1177_v37 = vsub.f32 %v1105_v40, %v1141_v28  ;;  %v2181_v61 = vpop.eup %2180  ;;  %v1300_v60 = vmul.f32 %v2179_v36, %v1264_v5  ;;  %v1212_v40 = vadd.f32 1e-05, %v1176_v53 }
 0x1e2   : > { %v729_v49 = vpop.xlane.xlu1 %728  ;;  %1565 = vperm.xlu0 %2148, %v1319_v47   ;;  %v1391_v9 = vmul.f32 %v1319_v47, %v3181_v7  ;;  %v1158_v0 = vsub.f32 %v1086_v3, %v1122_v6  ;;  %v1318_v38 = vmul.f32 %v2181_v61, %v1282_v29  ;;  %v3250_v23 = vmul.f32 0.0051020407, %v725_v58 }
 0x1e3   : > { %v1213_v46 = vadd.f32 1e-05, %v1177_v37  ;;  %v3235_v30 = vmul.f32 0.0051020407, %v729_v49  ;;  %v1372_v22 = vmul.f32 %v1300_v60, %v3188_v18  ;;  %v1357_v18 = vld [vmem:[%s3143_s19 + $0xd8] sm:$0xff] }
 0x1e4   : > { %v797_v33 = vpop.xlane.xlu0 %796  ;;  %1712 = vperm.xlu1 %2149, %v1406_v54   ;;  %v1427_v1 = vsub.f32 %v1355_v2, %v1391_v9  ;;  %v1194_v39 = vadd.f32 1e-05, %v1158_v0  ;;  %v1339_v54 = vld [vmem:[%s3143_s19 + $0x48] sm:$0xff]  ;;  %v1124_v58 = vmul.f32 %v3250_v23, %v3250_v23  ;;  %v1390_v11 = vmul.f32 %v1318_v38, %v3195_v45  ;;  %v1354_v0 = vld [vmem:[%s3143_s19 + $0xc0] sm:$0xff] }
 0x1e5   : > { %2184 = vrsqrt.f32 %v1213_v46  ;;  %v1125_v7 = vmul.f32 %v3235_v30, %v3235_v30  ;;  %v3255_v6 = vmul.f32 0.0051020407, %v797_v33 }
 0x1e6   : > { %v801_v8 = vpop.xlane.xlu1 %800  ;;  %1727 = vperm.xlu0 %2148, %v1409_v4   ;;  %2186 = vrsqrt.f32 %v1194_v39  ;;  %v1336_v4 = vld [vmem:[%s3143_s19 + $0x30] sm:$0xff]  ;;  %v1426_v45 = vsub.f32 %v1354_v0, %v1390_v11 }
 0x1e7   : > { %v3243_v48 = vmul.f32 0.0051020407, %v801_v8  ;;  %v1408_v36 = vsub.f32 %v1336_v4, %v1372_v22  ;;  %v1142_v35 = vmul.f32 %v3255_v6, %v3255_v6 }
 0x1e8   : > { %v977_v62 = vpop.xlane.xlu0 %976  ;;  %1802 = vperm.xlu1 %2149, %v1424_v52  }
 0x1e9   : > { %v1143_v56 = vmul.f32 %v3243_v48, %v3243_v48  ;;  %v1088_v9 = vmul.f32 0.0051020407, %v977_v62 }
 0x1ea   : > { %v981_v17 = vpop.xlane.xlu1 %980  ;;  %1817 = vperm.xlu0 %2148, %v1427_v1  }
 0x1eb   : > { %v2183_v19 = vpop.eup %2182  ;;  %v1089_v32 = vmul.f32 0.0051020407, %v981_v17 }
 0x1ec   : > { %v1049_v34 = vpop.xlane.xlu0 %1048  ;;  %1470 = vperm.xlu1 %2149, %v1300_v60   ;;  %v1303_v28 = vmul.f32 %v2183_v19, %v1267_v26  ;;  %v1269_v26 = vld [vmem:[%s3121_s6 + $0x58] sm:$0xff] }
 0x1ed   : > { %v1161_v42 = vsub.f32 %v1089_v32, %v1125_v7  ;;  %v1106_v5 = vmul.f32 0.0051020407, %v1049_v34  ;;  %v1266_v32 = vld [vmem:[%s3121_s6 + $0x40] sm:$0xff] }
 0x1ee   : > { %v1053_v43 = vpop.xlane.xlu1 %1052  ;;  %1485 = vperm.xlu0 %2148, %v1303_v28   ;;  %v1375_v55 = vmul.f32 %v1303_v28, %v3206_v12 }
 0x1ef   : > { %v2185_v59 = vpop.eup %2184  ;;  %v1197_v44 = vadd.f32 1e-05, %v1161_v42  ;;  %v1107_v47 = vmul.f32 0.0051020407, %v1053_v43  ;;  %v1178_v19 = vsub.f32 %v1106_v5, %v1142_v35  ;;  %v1359_v35 = vld [vmem:[%s3143_s19 + $0xe8] sm:$0xff] }
 0x1f0   : > { %v733_v37 = vpop.xlane.xlu0 %732  ;;  %1560 = vperm.xlu1 %2149, %v1318_v38   ;;  %v1321_v41 = vmul.f32 %v2185_v59, %v1285_v50  ;;  %v1411_v12 = vsub.f32 %v1339_v54, %v1375_v55  ;;  %v2187_v61 = vpop.eup %2186  ;;  %v1287_v50 = vld [vmem:[%s3121_s6 + $0xe8] sm:$0xff]  ;;  %v1284_v59 = vld [vmem:[%s3121_s6 + $0xd0] sm:$0xff] }
 0x1f1   : > { %2188 = vrsqrt.f32 %v1197_v44  ;;  %v1179_v49 = vsub.f32 %v1107_v47, %v1143_v56  ;;  %v1302_v38 = vmul.f32 %v2187_v61, %v1266_v32  ;;  %v1214_v44 = vadd.f32 1e-05, %v1178_v19 }
 0x1f2   : > { %v737_v46 = vpop.xlane.xlu1 %736  ;;  %1575 = vperm.xlu0 %2148, %v1321_v41   ;;  %2190 = vrsqrt.f32 %v1212_v40  ;;  %v1393_v8 = vmul.f32 %v1321_v41, %v3212_v63  ;;  %v3279_v55 = vmul.f32 0.0051020407, %v733_v37  ;;  %v1338_v37 = vld [vmem:[%s3143_s19 + $0x40] sm:$0xff] }
 0x1f3   : > { %v1215_v3 = vadd.f32 1e-05, %v1179_v49  ;;  %v3262_v52 = vmul.f32 0.0051020407, %v737_v46 }
 0x1f4   : > { %v805_v2 = vpop.xlane.xlu0 %804  ;;  %1475 = vperm.xlu1 %2149, %v3215_v27   ;;  %v1160_v27 = vsub.f32 %v1088_v9, %v1124_v58  ;;  %v1429_v63 = vsub.f32 %v1357_v18, %v1393_v8  ;;  %v1126_v18 = vmul.f32 %v3279_v55, %v3279_v55 }
 0x1f5   : > { %2192 = vrsqrt.f32 %v1215_v3  ;;  %v1127_v1 = vmul.f32 %v3262_v52, %v3262_v52  ;;  %v1341_v3 = vld [vmem:[%s3143_s19 + $0x58] sm:$0xff]  ;;  %v3283_v4 = vmul.f32 0.0051020407, %v805_v2 }
 0x1f6   : > { %v809_v33 = vpop.xlane.xlu1 %808  ;;  %1737 = vperm.xlu0 %2148, %v1411_v12   ;;  %v1196_v29 = vadd.f32 1e-05, %v1160_v27  ;;  %v1374_v12 = vmul.f32 %v1302_v38, %v3222_v51 }
 0x1f7   : > { %v3271_v7 = vmul.f32 0.0051020407, %v809_v33  ;;  %v1144_v51 = vmul.f32 %v3283_v4, %v3283_v4 }
 0x1f8   : > { %v985_v62 = vpop.xlane.xlu0 %984  ;;  %1722 = vperm.xlu1 %2149, %v1408_v36   ;;  %2194 = vrsqrt.f32 %v1196_v29  ;;  %v1410_v27 = vsub.f32 %v1338_v37, %v1374_v12  ;;  %v1343_v12 = vld [vmem:[%s3143_s19 + $0x68] sm:$0xff] }
 0x1f9   : > { %v1145_v56 = vmul.f32 %v3271_v7, %v3271_v7  ;;  %v1090_v33 = vmul.f32 0.0051020407, %v985_v62  ;;  %v1356_v62 = vld [vmem:[%s3143_s19 + $0xd0] sm:$0xff] }
 0x1fa   : > { %v989_v17 = vpop.xlane.xlu1 %988  ;;  %1827 = vperm.xlu0 %2148, %v1429_v63  }
 0x1fb   : > { %v2189_v60 = vpop.eup %2188  ;;  %v1091_v53 = vmul.f32 0.0051020407, %v989_v17 }
 0x1fc   : > { %v1057_v39 = vpop.xlane.xlu0 %1056  ;;  %1812 = vperm.xlu1 %2149, %v1426_v45   ;;  %v1305_v34 = vmul.f32 %v2189_v60, %v1269_v26  ;;  %v2191_v28 = vpop.eup %2190  ;;  %v1271_v45 = vld [vmem:[%s3121_s6 + $0x68] sm:$0xff] }
 0x1fd   : > { %v1163_v42 = vsub.f32 %v1091_v53, %v1127_v1  ;;  %v1320_v9 = vmul.f32 %v2191_v28, %v1284_v59  ;;  %v1108_v5 = vmul.f32 0.0051020407, %v1057_v39  ;;  %v1162_v1 = vsub.f32 %v1090_v33, %v1126_v18  ;;  %v1268_v39 = vld [vmem:[%s3121_s6 + $0x50] sm:$0xff] }
 0x1fe   : > { %v1061_v43 = vpop.xlane.xlu1 %1060  ;;  %1495 = vperm.xlu0 %2148, %v1305_v34   ;;  %v1377_v46 = vmul.f32 %v1305_v34, %v3235_v30 }
 0x1ff   : > { %v2193_v40 = vpop.eup %2192  ;;  %v1199_v47 = vadd.f32 1e-05, %v1163_v42  ;;  %v1109_v41 = vmul.f32 0.0051020407, %v1061_v43  ;;  %v1392_v63 = vmul.f32 %v1320_v9, %v3229_v57  ;;  %v1180_v19 = vsub.f32 %v1108_v5, %v1144_v51  ;;  %v1289_v43 = vld [vmem:[%s3121_s6 + $0xf8] sm:$0xff] }
 0x200   : > { %v741_v49 = vpop.xlane.xlu0 %740  ;;  %1480 = vperm.xlu1 %2149, %v1302_v38   ;;  %v1323_v54 = vmul.f32 %v2193_v40, %v1287_v50  ;;  %v1413_v36 = vsub.f32 %v1341_v3, %v1377_v46  ;;  %v1198_v34 = vadd.f32 1e-05, %v1162_v1  ;;  %v1358_v1 = vld [vmem:[%s3143_s19 + $0xe0] sm:$0xff] }
 0x201   : > { %2196 = vrsqrt.f32 %v1199_v47  ;;  %v1181_v22 = vsub.f32 %v1109_v41, %v1145_v56  ;;  %v1428_v32 = vsub.f32 %v1356_v62, %v1392_v63  ;;  %v1216_v38 = vadd.f32 1e-05, %v1180_v19  ;;  %v1286_v47 = vld [vmem:[%s3121_s6 + $0xe0] sm:$0xff] }
 0x202   : > { %v745_v58 = vpop.xlane.xlu1 %744  ;;  %1585 = vperm.xlu0 %2148, %v1323_v54   ;;  %2198 = vrsqrt.f32 %v1214_v44  ;;  %v1395_v2 = vmul.f32 %v1323_v54, %v3243_v48  ;;  %v2195_v60 = vpop.eup %2194  ;;  %v3307_v54 = vmul.f32 0.0051020407, %v741_v49 }
 0x203   : > { %v1217_v8 = vadd.f32 1e-05, %v1181_v22  ;;  %v3290_v11 = vmul.f32 0.0051020407, %v745_v58  ;;  %v1304_v44 = vmul.f32 %v2195_v60, %v1268_v39  ;;  %v1273_v60 = vld [vmem:[%s3121_s6 + $0x78] sm:$0xff]  ;;  %v1270_v39 = vld [vmem:[%s3121_s6 + $0x60] sm:$0xff] }
 0x204   : > { %v813_v30 = vpop.xlane.xlu0 %812  ;;  %1570 = vperm.xlu1 %2149, %v1320_v9   ;;  %v1431_v48 = vsub.f32 %v1359_v35, %v1395_v2  ;;  %v1128_v49 = vmul.f32 %v3307_v54, %v3307_v54 }
 0x205   : > { %2200 = vrsqrt.f32 %v1217_v8  ;;  %v1129_v61 = vmul.f32 %v3290_v11, %v3290_v11  ;;  %v1376_v18 = vmul.f32 %v1304_v44, %v3250_v23  ;;  %v3315_v2 = vmul.f32 0.0051020407, %v813_v30  ;;  %v1361_v23 = vld [vmem:[%s3143_s19 + $0xf8] sm:$0xff] }
 0x206   : > { %v817_v0 = vpop.xlane.xlu1 %816  ;;  %1747 = vperm.xlu0 %2148, %v1413_v36   ;;  %2202 = vrsqrt.f32 %v1198_v34  ;;  %v1340_v36 = vld [vmem:[%s3143_s19 + $0x50] sm:$0xff] }
 0x207   : > { %v3299_v17 = vmul.f32 0.0051020407, %v817_v0  ;;  %v1412_v63 = vsub.f32 %v1340_v36, %v1376_v18  ;;  %v1146_v30 = vmul.f32 %v3315_v2, %v3315_v2  ;;  %v1342_v36 = vld [vmem:[%s3143_s19 + $0x60] sm:$0xff] }
 0x208   : > { %v993_v26 = vpop.xlane.xlu0 %992  ;;  %1732 = vperm.xlu1 %2149, %v1410_v27  }
 0x209   : > { %v1147_v42 = vmul.f32 %v3299_v17, %v3299_v17  ;;  %v1092_v35 = vmul.f32 0.0051020407, %v993_v26 }
 0x20a   : > { %v997_v53 = vpop.xlane.xlu1 %996  ;;  %1837 = vperm.xlu0 %2148, %v1431_v48  }
 0x20b   : > { %v2197_v57 = vpop.eup %2196  ;;  %v1093_v29 = vmul.f32 0.0051020407, %v997_v53  ;;  %v1164_v26 = vsub.f32 %v1092_v35, %v1128_v49 }
 0x20c   : > { %1822 = vperm.xlu1 %2149, %v1428_v32   ;;  %v1307_v28 = vmul.f32 %v2197_v57, %v1271_v45  ;;  %v2199_v56 = vpop.eup %2198  ;;  %v1065_v59 = vpop.xlane.xlu0 %1064 }
 0x20d   : > { %v1165_v50 = vsub.f32 %v1093_v29, %v1129_v61  ;;  %v1322_v37 = vmul.f32 %v2199_v56, %v1286_v47  ;;  %v1110_v48 = vmul.f32 0.0051020407, %v1065_v59  ;;  %v1200_v34 = vadd.f32 1e-05, %v1164_v26 }
 0x20e   : > { %v1069_v40 = vpop.xlane.xlu1 %1068  ;;  %1505 = vperm.xlu0 %2148, %v1307_v28   ;;  %v1379_v58 = vmul.f32 %v1307_v28, %v3262_v52 }
 0x20f   : > { %v2201_v41 = vpop.eup %2200  ;;  %v1201_v46 = vadd.f32 1e-05, %v1165_v50  ;;  %v1111_v22 = vmul.f32 0.0051020407, %v1069_v40  ;;  %v1394_v62 = vmul.f32 %v1322_v37, %v3255_v6  ;;  %v1182_v28 = vsub.f32 %v1110_v48, %v1146_v30  ;;  %v1275_v48 = vld [vmem:[%s3121_s6 + $0x88] sm:$0xff] }
 0x210   : > { %1490 = vperm.xlu1 %2149, %v1304_v44   ;;  %v1325_v3 = vmul.f32 %v2201_v41, %v1289_v43  ;;  %v749_v52 = vpop.xlane.xlu0 %748  ;;  %v1415_v51 = vsub.f32 %v1343_v12, %v1379_v58  ;;  %v2203_v19 = vpop.eup %2202 }
 0x211   : > { %2204 = vrsqrt.f32 %v1201_v46  ;;  %v1183_v9 = vsub.f32 %v1111_v22, %v1147_v42  ;;  %v1430_v32 = vsub.f32 %v1358_v1, %v1394_v62  ;;  %v1306_v40 = vmul.f32 %v2203_v19, %v1270_v39  ;;  %v1288_v46 = vld [vmem:[%s3121_s6 + $0xf0] sm:$0xff]  ;;  %v1290_v39 = vld [vmem:[%s3121_s6 + $0x100] sm:$0xff] }
 0x212   : > { %1595 = vperm.xlu0 %2148, %v1325_v3   ;;  %v753_v8 = vpop.xlane.xlu1 %752  ;;  %2206 = vrsqrt.f32 %v1216_v38  ;;  %v1397_v5 = vmul.f32 %v1325_v3, %v3271_v7  ;;  %v1291_v38 = vld [vmem:[%s3121_s6 + $0x108] sm:$0xff]  ;;  %v1218_v22 = vadd.f32 1e-05, %v1182_v28  ;;  %v3336_v12 = vmul.f32 0.0051020407, %v749_v52  ;;  %v1360_v62 = vld [vmem:[%s3143_s19 + $0xf0] sm:$0xff] }
 0x213   : > { %v1219_v33 = vadd.f32 1e-05, %v1183_v9  ;;  %v3318_v0 = vmul.f32 0.0051020407, %v753_v8  ;;  %v1378_v49 = vmul.f32 %v1306_v40, %v3279_v55  ;;  %v1272_v19 = vld [vmem:[%s3121_s6 + $0x70] sm:$0xff] }
 0x214   : > { %1580 = vperm.xlu1 %2149, %v1322_v37   ;;  %v1433_v61 = vsub.f32 %v1361_v23, %v1397_v5  ;;  %v821_v53 = vpop.xlane.xlu0 %820  ;;  %v1345_v37 = vld [vmem:[%s3143_s19 + $0x78] sm:$0xff]  ;;  %v1363_v23 = vld [vmem:[%s3143_s19 + $0x108] sm:$0xff] }
 0x215   : > { %2208 = vrsqrt.f32 %v1219_v33  ;;  %v1131_v7 = vmul.f32 %v3318_v0, %v3318_v0  ;;  %v3344_v52 = vmul.f32 0.0051020407, %v821_v53  ;;  %v1414_v55 = vsub.f32 %v1342_v36, %v1378_v49 }
 0x216   : > { %1757 = vperm.xlu0 %2148, %v1415_v51   ;;  %v825_v27 = vpop.xlane.xlu1 %824  ;;  %2210 = vrsqrt.f32 %v1200_v34 }
 0x217   : > { %v3327_v45 = vmul.f32 0.0051020407, %v825_v27 }
 0x218   : > { %1742 = vperm.xlu1 %2149, %v1412_v63   ;;  %v1001_v3 = vpop.xlane.xlu0 %1000 }
 0x219   : > { %v1149_v50 = vmul.f32 %v3327_v45, %v3327_v45  ;;  %v1094_v5 = vmul.f32 0.0051020407, %v1001_v3 }
 0x21a   : > { %1847 = vperm.xlu0 %2148, %v1433_v61   ;;  %v1005_v6 = vpop.xlane.xlu1 %1004 }
 0x21b   : > { %v2205_v57 = vpop.eup %2204  ;;  %v1095_v29 = vmul.f32 0.0051020407, %v1005_v6 }
 0x21c   : > { %1832 = vperm.xlu1 %2149, %v1430_v32   ;;  %v1309_v56 = vmul.f32 %v2205_v57, %v1273_v60  ;;  %v2207_v42 = vpop.eup %2206  ;;  %v1073_v27 = vpop.xlane.xlu0 %1072  ;;  %v1293_v32 = vld [vmem:[%s3121_s6 + $0x118] sm:$0xff] }
 0x21d   : > { %v1167_v43 = vsub.f32 %v1095_v29, %v1131_v7  ;;  %v1324_v18 = vmul.f32 %v2207_v42, %v1288_v46  ;;  %v1112_v26 = vmul.f32 0.0051020407, %v1073_v27 }
 0x21e   : > { %1515 = vperm.xlu0 %2148, %v1309_v56   ;;  %v1077_v59 = vpop.xlane.xlu1 %1076  ;;  %v1381_v9 = vmul.f32 %v1309_v56, %v3290_v11  ;;  %v1130_v11 = vmul.f32 %v3336_v12, %v3336_v12 }
 0x21f   : > { %v2209_v44 = vpop.eup %2208  ;;  %v1203_v47 = vadd.f32 1e-05, %v1167_v43  ;;  %v1113_v41 = vmul.f32 0.0051020407, %v1077_v59  ;;  %v1396_v63 = vmul.f32 %v1324_v18, %v3283_v4 }
 0x220   : > { %1500 = vperm.xlu1 %2149, %v1306_v40   ;;  %v1327_v58 = vmul.f32 %v2209_v44, %v1291_v38  ;;  %v1417_v35 = vsub.f32 %v1345_v37, %v1381_v9  ;;  %v1166_v30 = vsub.f32 %v1094_v5, %v1130_v11  ;;  %v2211_v61 = vpop.eup %2210  ;;  %v1347_v38 = vld [vmem:[%s3143_s19 + $0x88] sm:$0xff]  ;;  %v1274_v5 = vld [vmem:[%s3121_s6 + $0x80] sm:$0xff] }
 0x221   : > { %2212 = vrsqrt.f32 %v1203_v47  ;;  %v1185_v8 = vsub.f32 %v1113_v41, %v1149_v50  ;;  %v1432_v7 = vsub.f32 %v1360_v62, %v1396_v63  ;;  %v1308_v29 = vmul.f32 %v2211_v61, %v1272_v19  ;;  %v1344_v47 = vld [vmem:[%s3143_s19 + $0x70] sm:$0xff]  ;;  %v1346_v61 = vld [vmem:[%s3143_s19 + $0x80] sm:$0xff] }
 0x222   : > { %1605 = vperm.xlu0 %2148, %v1327_v58   ;;  %2214 = vrsqrt.f32 %v1218_v22  ;;  %v1399_v51 = vmul.f32 %v1327_v58, %v3299_v17  ;;  %v1148_v17 = vmul.f32 %v3344_v52, %v3344_v52  ;;  %v1202_v4 = vadd.f32 1e-05, %v1166_v30  ;;  %v1365_v22 = vld [vmem:[%s3143_s19 + $0x118] sm:$0xff]  ;;  %v1362_v58 = vld [vmem:[%s3143_s19 + $0x100] sm:$0xff] }
 0x223   : > { %v1221_v33 = vadd.f32 1e-05, %v1185_v8  ;;  %v1380_v59 = vmul.f32 %v1308_v29, %v3307_v54 }
 0x224   : > { %1590 = vperm.xlu1 %2149, %v1324_v18   ;;  %v1435_v1 = vsub.f32 %v1363_v23, %v1399_v51  ;;  %v1184_v6 = vsub.f32 %v1112_v26, %v1148_v17 }
 0x225   : > { %2216 = vrsqrt.f32 %v1221_v33  ;;  %v1416_v3 = vsub.f32 %v1344_v47, %v1380_v59 }
 0x226   : > { %1767 = vperm.xlu0 %2148, %v1417_v35   ;;  %2218 = vrsqrt.f32 %v1202_v4  ;;  %v1220_v50 = vadd.f32 1e-05, %v1184_v6  ;;  %v1364_v4 = vld [vmem:[%s3143_s19 + $0x110] sm:$0xff]  ;;  %v3688_v6 = vld [vmem:[#allocation7_spill] sm:$0xff] }
 0x228   : > { %1752 = vperm.xlu1 %2149, %v1414_v55   ;;  %2220 = vrsqrt.f32 %v1220_v50  ;;  %v3691_v50 = vld [vmem:[#allocation8_spill] sm:$0xff] }
 0x22a   : > { %1857 = vperm.xlu0 %2148, %v1435_v1   ;;  %v1292_v1 = vld [vmem:[%s3121_s6 + $0x110] sm:$0xff] }
 0x22b   : > { %v2213_v60 = vpop.eup %2212 }
 0x22c   : > { %1842 = vperm.xlu1 %2149, %v1432_v7   ;;  %v1311_v53 = vmul.f32 %v2213_v60, %v1275_v48  ;;  %v2215_v57 = vpop.eup %2214 }
 0x22d   : > { %v1326_v43 = vmul.f32 %v2215_v57, %v1290_v39  ;;  %v3689_v57 = vld [vmem:[#allocation9_spill] sm:$0xff] }
 0x22e   : > { %1525 = vperm.xlu0 %2148, %v1311_v53   ;;  %v1383_v42 = vmul.f32 %v1311_v53, %v3318_v0 }
 0x22f   : > { %v2217_v34 = vpop.eup %2216  ;;  %v1441_v28 = vpop.permute.xlu0 %1440  ;;  %v1398_v0 = vmul.f32 %v1326_v43, %v3315_v2 }
 0x230   : > { %1510 = vperm.xlu1 %2149, %v1308_v29   ;;  %v1329_v56 = vmul.f32 %v2217_v34, %v1293_v32  ;;  %v1419_v41 = vsub.f32 %v1347_v38, %v1383_v42  ;;  %v1618_v2 = vmul.f32 %v1441_v28, %v2506_v13  ;;  %v2219_v35 = vpop.eup %2218  ;;  %v3690_v42 = vld [vmem:[#allocation6_spill] sm:$0xff] }
 0x231   : > { %v1434_v49 = vsub.f32 %v1362_v58, %v1398_v0  ;;  %v1310_v55 = vmul.f32 %v2219_v35, %v1274_v5  ;;  %v3692_v38 = vld [vmem:[#allocation2_spill] sm:$0xff]  ;;  %v3694_v58 = vld [vmem:[#allocation3_spill] sm:$0xff] }
 0x232   : > { %1615 = vperm.xlu0 %2148, %v1329_v56   ;;  %v1401_v46 = vmul.f32 %v1329_v56, %v3327_v45  ;;  %v1619_v45 = vmul.f32 %v1441_v28, %v2510_v15  ;;  %v2221_v63 = vpop.eup %2220 }
 0x233   : > { %v1536_v40 = vpop.permute.xlu0 %1535  ;;  %v1531_v44 = vpop.permute.xlu1 %1530 }
 0x234   : > { %1600 = vperm.xlu1 %2149, %v1326_v43   ;;  %v1437_v18 = vsub.f32 %v1365_v22, %v1401_v46  ;;  %v1656_v33 = vmul.f32 %v1536_v40, %v2524_v21  ;;  %v1655_v27 = vmul.f32 %v1531_v44, %v2512_v16  ;;  %v1382_v16 = vmul.f32 %v1310_v55, %v3336_v12 }
 0x236   : > { %1777 = vperm.xlu0 %2148, %v1419_v41   ;;  %v1418_v60 = vsub.f32 %v1346_v61, %v1382_v16  ;;  %v3702_v61 = vld [vmem:[#allocation11_spill] sm:$0xff] }
 0x237   : > { %v1698_v9 = vpop.permute.xlu0 %1697  ;;  %v1446_v8 = vpop.permute.xlu1 %1445 }
 0x238   : > { %v1620_v37 = vmul.f32 %v1446_v8, %v2522_v20  ;;  %v1621_v54 = vmul.f32 %v1446_v8, %v2530_v24  ;;  %1762 = vperm.xlu1 %2149, %v1416_v3   ;;  %v1657_v20 = vmul.f32 %v1536_v40, %v2532_v25  ;;  %v1654_v25 = vmul.f32 %v1531_v44, %v2508_v14  ;;  %v3693_v40 = vld [vmem:[#allocation4_spill] sm:$0xff]  ;;  %v3695_v8 = vld [vmem:[#allocation5_spill] sm:$0xff] }
 0x239   : > { %v1328_v14 = vmul.f32 %v2221_v63, %v1292_v1 }
 0x23a   : > { %v1872_v36 = vadd.f32 %v1698_v9, %v1620_v37  ;;  %v1873_v24 = vadd.f32 %v1698_v9, %v1621_v54  ;;  %1867 = vperm.xlu0 %2148, %v1437_v18  }
 0x23b   : > { %v1788_v51 = vpop.permute.xlu0 %1787  ;;  %v1693_v11 = vpop.permute.xlu1 %1692  ;;  %v1400_v19 = vmul.f32 %v1328_v14, %v3344_v52 }
 0x23c   : > { %1944 = vst [vmem:[%s3369_s12 + $0x10] sm:$0xff] %v1872_v36  ;;  %1945 = vst.msk [vmem:[%s3369_s12 + $0x18] sm:$0xff] %vm681_vm1, %v1873_v24  ;;  %v1908_v13 = vadd.f32 %v1788_v51, %v1656_v33  ;;  %v1909_v15 = vadd.f32 %v1788_v51, %v1657_v20  ;;  %v1870_v21 = vadd.f32 %v1693_v11, %v1618_v2  ;;  %1852 = vperm.xlu1 %2149, %v1434_v49   ;;  %v3696_v33 = vld [vmem:[#allocation15_spill] sm:$0xff]  ;;  %v3697_v36 = vld [vmem:[#allocation17_spill] sm:$0xff] }
 0x23d   : > { %v1871_v23 = vadd.f32 %v1693_v11, %v1619_v45  ;;  %v1436_v28 = vsub.f32 %v1364_v4, %v1400_v19  ;;  %v3704_v4 = vld [vmem:[#allocation23_spill] sm:$0xff] }
 0x23e   : > { %1980 = vst [vmem:[%s3369_s12 + $0x130] sm:$0xff] %v1908_v13  ;;  %1981 = vst.msk [vmem:[%s3369_s12 + $0x138] sm:$0xff] %vm681_vm1, %v1909_v15  ;;  %v3698_v15 = vld [vmem:[#allocation14_spill] sm:$0xff] }
 0x23f   : > { %1942 = vst [vmem:[%s3369_s12] sm:$0xff] %v1870_v21  ;;  %1943 = vst.msk [vmem:[%s3369_s12 + $0x8] sm:$0xff] %vm681_vm1, %v1871_v23  ;;  %v1783_v62 = vpop.permute.xlu1 %1782  ;;  %v3699_v23 = vld [vmem:[#allocation16_spill] sm:$0xff] }
 0x240   : > { %v1906_v17 = vadd.f32 %v1783_v62, %v1654_v25  ;;  %v1907_v30 = vadd.f32 %v1783_v62, %v1655_v27  ;;  %1520 = vperm.xlu1 %2149, %v1310_v55   ;;  %v3700_v55 = vld [vmem:[#allocation10_spill] sm:$0xff]  ;;  %v3701_v62 = vld [vmem:[#allocation12_spill] sm:$0xff] }
 0x241   : > { %v1546_v26 = vpop.permute.xlu0 %1545 }
 0x242   : > { %1978 = vst [vmem:[%s3369_s12 + $0x120] sm:$0xff] %v1906_v17  ;;  %1979 = vst.msk [vmem:[%s3369_s12 + $0x128] sm:$0xff] %vm681_vm1, %v1907_v30  ;;  %v1660_v32 = vmul.f32 %v1546_v26, %v3688_v6  ;;  %v1661_v29 = vmul.f32 %v1546_v26, %v3689_v57 }
 0x243   : > { %v1451_v48 = vpop.permute.xlu1 %1450 }
 0x244   : > { %1610 = vperm.xlu1 %2149, %v1328_v14   ;;  %v1622_v59 = vmul.f32 %v1451_v48, %v3692_v38  ;;  %v1623_v44 = vmul.f32 %v1451_v48, %v3693_v40  ;;  %v3706_v38 = vld [vmem:[#allocation30_spill] sm:$0xff]  ;;  %v3707_v40 = vld [vmem:[#allocation32_spill] sm:$0xff] }
 0x245   : > { %v1708_v7 = vpop.permute.xlu0 %1707 }
 0x247   : > { %v1541_v53 = vpop.permute.xlu1 %1540 }
 0x248   : > { %1772 = vperm.xlu1 %2149, %v1418_v60   ;;  %v1658_v9 = vmul.f32 %v1541_v53, %v3694_v58  ;;  %v1659_v37 = vmul.f32 %v1541_v53, %v3695_v8  ;;  %v3703_v60 = vld [vmem:[#allocation13_spill] sm:$0xff]  ;;  %v3711_v58 = vld [vmem:[#allocation20_spill] sm:$0xff] }
 0x249   : > { %v1798_v39 = vpop.permute.xlu0 %1797 }
 0x24a   : > { %v1912_v12 = vadd.f32 %v1798_v39, %v1660_v32  ;;  %v1913_v34 = vadd.f32 %v1798_v39, %v1661_v29  ;;  %v3705_v32 = vld [vmem:[#allocation25_spill] sm:$0xff] }
 0x24b   : > { %v1456_v56 = vpop.permute.xlu1 %1455 }
 0x24c   : > { %1984 = vst [vmem:[%s3369_s12 + $0x150] sm:$0xff] %v1912_v12  ;;  %1985 = vst.msk [vmem:[%s3369_s12 + $0x158] sm:$0xff] %vm681_vm1, %v1913_v34  ;;  %v1624_v52 = vmul.f32 %v1456_v56, %v3690_v42  ;;  %v1625_v43 = vmul.f32 %v1456_v56, %v3691_v50  ;;  %1862 = vperm.xlu1 %2149, %v1436_v28  }
 0x24e   : > { %v1876_v47 = vadd.f32 %v1708_v7, %v1624_v52  ;;  %v1877_v41 = vadd.f32 %v1708_v7, %v1625_v43 }
 0x24f   : > { %v1703_v46 = vpop.permute.xlu1 %1702 }
 0x250   : > { %1948 = vst [vmem:[%s3369_s12 + $0x30] sm:$0xff] %v1876_v47  ;;  %1949 = vst.msk [vmem:[%s3369_s12 + $0x38] sm:$0xff] %vm681_vm1, %v1877_v41  ;;  %v1874_v22 = vadd.f32 %v1703_v46, %v1622_v59  ;;  %v1875_v0 = vadd.f32 %v1703_v46, %v1623_v44  ;;  %v3708_v47 = vld [vmem:[#allocation22_spill] sm:$0xff]  ;;  %v3709_v46 = vld [vmem:[#allocation24_spill] sm:$0xff] }
 0x251   : > { %v1556_v3 = vpop.permute.xlu0 %1555 }
 0x252   : > { %1946 = vst [vmem:[%s3369_s12 + $0x20] sm:$0xff] %v1874_v22  ;;  %1947 = vst.msk [vmem:[%s3369_s12 + $0x28] sm:$0xff] %vm681_vm1, %v1875_v0  ;;  %v1664_v20 = vmul.f32 %v1556_v3, %v3696_v33  ;;  %v1665_v24 = vmul.f32 %v1556_v3, %v3697_v36  ;;  %v3710_v0 = vld [vmem:[#allocation18_spill] sm:$0xff] }
 0x253   : > { %v1793_v54 = vpop.permute.xlu1 %1792 }
 0x254   : > { %v1910_v18 = vadd.f32 %v1793_v54, %v1658_v9  ;;  %v1911_v2 = vadd.f32 %v1793_v54, %v1659_v37 }
 0x255   : > { %v1718_v45 = vpop.permute.xlu0 %1717 }
 0x256   : > { %1982 = vst [vmem:[%s3369_s12 + $0x140] sm:$0xff] %v1910_v18  ;;  %1983 = vst.msk [vmem:[%s3369_s12 + $0x148] sm:$0xff] %vm681_vm1, %v1911_v2 }
 0x257   : > { %v1461_v49 = vpop.permute.xlu1 %1460 }
 0x258   : > { %v1626_v63 = vmul.f32 %v1461_v49, %v3700_v55  ;;  %v1627_v1 = vmul.f32 %v1461_v49, %v3701_v62  ;;  %v3712_v49 = vld [vmem:[#allocation31_spill] sm:$0xff] }
 0x259   : > { %v1808_v35 = vpop.permute.xlu0 %1807 }
 0x25a   : > { %v1916_v51 = vadd.f32 %v1808_v35, %v1664_v20  ;;  %v1917_v11 = vadd.f32 %v1808_v35, %v1665_v24  ;;  %v3713_v20 = vld [vmem:[#allocation33_spill] sm:$0xff] }
 0x25b   : > { %v1551_v5 = vpop.permute.xlu1 %1550 }
 0x25c   : > { %1988 = vst [vmem:[%s3369_s12 + $0x170] sm:$0xff] %v1916_v51  ;;  %1989 = vst.msk [vmem:[%s3369_s12 + $0x178] sm:$0xff] %vm681_vm1, %v1917_v11  ;;  %v1662_v7 = vmul.f32 %v1551_v5, %v3702_v61  ;;  %v1663_v19 = vmul.f32 %v1551_v5, %v3703_v60  ;;  %v3714_v11 = vld [vmem:[#allocation19_spill] sm:$0xff]  ;;  %v3718_v61 = vld [vmem:[#allocation26_spill] sm:$0xff] }
 0x25d   : > { %v3719_v60 = vld [vmem:[#allocation28_spill] sm:$0xff] }
 0x25f   : > { %v1466_v13 = vpop.permute.xlu1 %1465 }
 0x260   : > { %v1628_v21 = vmul.f32 %v1466_v13, %v3698_v15  ;;  %v1629_v25 = vmul.f32 %v1466_v13, %v3699_v23  ;;  %v3715_v13 = vld [vmem:[#allocation21_spill] sm:$0xff] }
 0x261   : > { %v1566_v27 = vpop.permute.xlu0 %1565 }
 0x262   : > { %v1880_v17 = vadd.f32 %v1718_v45, %v1628_v21  ;;  %v1881_v30 = vadd.f32 %v1718_v45, %v1629_v25  ;;  %v1668_v6 = vmul.f32 %v1566_v27, %v3704_v4  ;;  %v1669_v57 = vmul.f32 %v1566_v27, %v3705_v32  ;;  %v3720_v32 = vld [vmem:[#allocation39_spill] sm:$0xff] }
 0x263   : > { %v1713_v26 = vpop.permute.xlu1 %1712 }
 0x264   : > { %1952 = vst [vmem:[%s3369_s12 + $0x50] sm:$0xff] %v1880_v17  ;;  %1953 = vst.msk [vmem:[%s3369_s12 + $0x58] sm:$0xff] %vm681_vm1, %v1881_v30  ;;  %v1878_v14 = vadd.f32 %v1713_v26, %v1626_v63  ;;  %v1879_v16 = vadd.f32 %v1713_v26, %v1627_v1  ;;  %v3716_v30 = vld [vmem:[#allocation38_spill] sm:$0xff] }
 0x265   : > { %v1728_v48 = vpop.permute.xlu0 %1727 }
 0x266   : > { %1950 = vst [vmem:[%s3369_s12 + $0x40] sm:$0xff] %v1878_v14  ;;  %1951 = vst.msk [vmem:[%s3369_s12 + $0x48] sm:$0xff] %vm681_vm1, %v1879_v16  ;;  %v3717_v14 = vld [vmem:[#allocation40_spill] sm:$0xff] }
 0x267   : > { %v1803_v53 = vpop.permute.xlu1 %1802 }
 0x268   : > { %v1914_v29 = vadd.f32 %v1803_v53, %v1662_v7  ;;  %v1915_v39 = vadd.f32 %v1803_v53, %v1663_v19 }
 0x269   : > { %v1818_v12 = vpop.permute.xlu0 %1817 }
 0x26a   : > { %1986 = vst [vmem:[%s3369_s12 + $0x160] sm:$0xff] %v1914_v29  ;;  %1987 = vst.msk [vmem:[%s3369_s12 + $0x168] sm:$0xff] %vm681_vm1, %v1915_v39  ;;  %v1920_v34 = vadd.f32 %v1818_v12, %v1668_v6  ;;  %v1921_v28 = vadd.f32 %v1818_v12, %v1669_v57  ;;  %v3721_v29 = vld [vmem:[#allocation41_spill] sm:$0xff] }
 0x26b   : > { %v1471_v56 = vpop.permute.xlu1 %1470 }
 0x26c   : > { %1992 = vst [vmem:[%s3369_s12 + $0x190] sm:$0xff] %v1920_v34  ;;  %1993 = vst.msk [vmem:[%s3369_s12 + $0x198] sm:$0xff] %vm681_vm1, %v1921_v28  ;;  %v1630_v3 = vmul.f32 %v1471_v56, %v3710_v0  ;;  %v1631_v9 = vmul.f32 %v1471_v56, %v3711_v58  ;;  %v3722_v56 = vld [vmem:[#allocation27_spill] sm:$0xff]  ;;  %v3724_v0 = vld [vmem:[#allocation46_spill] sm:$0xff] }
 0x26d   : > { %v1486_v42 = vpop.permute.xlu0 %1485  ;;  %v3725_v58 = vld [vmem:[#allocation48_spill] sm:$0xff] }
 0x26e   : > { %v1636_v59 = vmul.f32 %v1486_v42, %v3706_v38  ;;  %v1637_v44 = vmul.f32 %v1486_v42, %v3707_v40 }
 0x26f   : > { %v1561_v52 = vpop.permute.xlu1 %1560 }
 0x270   : > { %v1666_v5 = vmul.f32 %v1561_v52, %v3714_v11  ;;  %v1667_v15 = vmul.f32 %v1561_v52, %v3715_v13  ;;  %v3723_v52 = vld [vmem:[#allocation29_spill] sm:$0xff]  ;;  %v3730_v13 = vld [vmem:[#allocation35_spill] sm:$0xff] }
 0x271   : > { %v1576_v50 = vpop.permute.xlu0 %1575 }
 0x272   : > { %v1672_v33 = vmul.f32 %v1576_v50, %v3712_v49  ;;  %v1673_v36 = vmul.f32 %v1576_v50, %v3713_v20  ;;  %v3728_v20 = vld [vmem:[#allocation47_spill] sm:$0xff] }
 0x273   : > { %v1476_v43 = vpop.permute.xlu1 %1475 }
 0x274   : > { %v1632_v41 = vmul.f32 %v1476_v43, %v3708_v47  ;;  %v1633_v22 = vmul.f32 %v1476_v43, %v3709_v46 }
 0x275   : > { %v1738_v8 = vpop.permute.xlu0 %1737 }
 0x276   : > { %v1884_v37 = vadd.f32 %v1728_v48, %v1632_v41  ;;  %v1885_v54 = vadd.f32 %v1728_v48, %v1633_v22  ;;  %v1888_v18 = vadd.f32 %v1738_v8, %v1636_v59  ;;  %v1889_v2 = vadd.f32 %v1738_v8, %v1637_v44 }
 0x277   : > { %v1723_v45 = vpop.permute.xlu1 %1722 }
 0x278   : > { %1956 = vst [vmem:[%s3369_s12 + $0x70] sm:$0xff] %v1884_v37  ;;  %1957 = vst.msk [vmem:[%s3369_s12 + $0x78] sm:$0xff] %vm681_vm1, %v1885_v54  ;;  %v1882_v24 = vadd.f32 %v1723_v45, %v1630_v3  ;;  %v1883_v35 = vadd.f32 %v1723_v45, %v1631_v9  ;;  %v3726_v37 = vld [vmem:[#allocation34_spill] sm:$0xff] }
 0x279   : > { %1960 = vst [vmem:[%s3369_s12 + $0x90] sm:$0xff] %v1888_v18  ;;  %1961 = vst.msk [vmem:[%s3369_s12 + $0x98] sm:$0xff] %vm681_vm1, %v1889_v2  ;;  %v1828_v51 = vpop.permute.xlu0 %1827  ;;  %v3727_v18 = vld [vmem:[#allocation36_spill] sm:$0xff] }
 0x27a   : > { %1954 = vst [vmem:[%s3369_s12 + $0x60] sm:$0xff] %v1882_v24  ;;  %1955 = vst.msk [vmem:[%s3369_s12 + $0x68] sm:$0xff] %vm681_vm1, %v1883_v35  ;;  %v1924_v21 = vadd.f32 %v1828_v51, %v1672_v33  ;;  %v1925_v23 = vadd.f32 %v1828_v51, %v1673_v36  ;;  %v3729_v24 = vld [vmem:[#allocation49_spill] sm:$0xff] }
 0x27b   : > { %v1813_v25 = vpop.permute.xlu1 %1812 }
 0x27c   : > { %1996 = vst [vmem:[%s3369_s12 + $0x1b0] sm:$0xff] %v1924_v21  ;;  %1997 = vst.msk [vmem:[%s3369_s12 + $0x1b8] sm:$0xff] %vm681_vm1, %v1925_v23  ;;  %v1918_v27 = vadd.f32 %v1813_v25, %v1666_v5  ;;  %v1919_v55 = vadd.f32 %v1813_v25, %v1667_v15  ;;  %v3731_v21 = vld [vmem:[#allocation37_spill] sm:$0xff] }
 0x27d   : > { %v1496_v63 = vpop.permute.xlu0 %1495 }
 0x27e   : > { %1990 = vst [vmem:[%s3369_s12 + $0x180] sm:$0xff] %v1918_v27  ;;  %1991 = vst.msk [vmem:[%s3369_s12 + $0x188] sm:$0xff] %vm681_vm1, %v1919_v55  ;;  %v1640_v26 = vmul.f32 %v1496_v63, %v3716_v30  ;;  %v1641_v16 = vmul.f32 %v1496_v63, %v3717_v14  ;;  %v3732_v14 = vld [vmem:[#allocation54_spill] sm:$0xff] }
 0x27f   : > { %v1481_v62 = vpop.permute.xlu1 %1480 }
 0x280   : > { %v1634_v7 = vmul.f32 %v1481_v62, %v3718_v61  ;;  %v1635_v19 = vmul.f32 %v1481_v62, %v3719_v60  ;;  %v3734_v60 = vld [vmem:[#allocation42_spill] sm:$0xff] }
 0x281   : > { %v1586_v1 = vpop.permute.xlu0 %1585 }
 0x282   : > { %v1676_v57 = vmul.f32 %v1586_v1, %v3720_v32  ;;  %v1677_v39 = vmul.f32 %v1586_v1, %v3721_v29  ;;  %v3736_v29 = vld [vmem:[#allocation55_spill] sm:$0xff] }
 0x283   : > { %v1571_v17 = vpop.permute.xlu1 %1570 }
 0x284   : > { %v1670_v42 = vmul.f32 %v1571_v17, %v3722_v56  ;;  %v1671_v50 = vmul.f32 %v1571_v17, %v3723_v52  ;;  %v3738_v52 = vld [vmem:[#allocation43_spill] sm:$0xff] }
 0x285   : > { %v1748_v48 = vpop.permute.xlu0 %1747 }
 0x286   : > { %v1892_v53 = vadd.f32 %v1748_v48, %v1640_v26  ;;  %v1893_v4 = vadd.f32 %v1748_v48, %v1641_v16  ;;  %v3733_v48 = vld [vmem:[#allocation56_spill] sm:$0xff] }
 0x287   : > { %v1733_v6 = vpop.permute.xlu1 %1732 }
 0x288   : > { %1964 = vst [vmem:[%s3369_s12 + $0xb0] sm:$0xff] %v1892_v53  ;;  %1965 = vst.msk [vmem:[%s3369_s12 + $0xb8] sm:$0xff] %vm681_vm1, %v1893_v4  ;;  %v1886_v12 = vadd.f32 %v1733_v6, %v1634_v7  ;;  %v1887_v34 = vadd.f32 %v1733_v6, %v1635_v19  ;;  %v3735_v53 = vld [vmem:[#allocation44_spill] sm:$0xff] }
 0x289   : > { %v1838_v28 = vpop.permute.xlu0 %1837 }
 0x28a   : > { %1958 = vst [vmem:[%s3369_s12 + $0x80] sm:$0xff] %v1886_v12  ;;  %1959 = vst.msk [vmem:[%s3369_s12 + $0x88] sm:$0xff] %vm681_vm1, %v1887_v34  ;;  %v1928_v43 = vadd.f32 %v1838_v28, %v1676_v57  ;;  %v1929_v38 = vadd.f32 %v1838_v28, %v1677_v39  ;;  %v3737_v12 = vld [vmem:[#allocation57_spill] sm:$0xff] }
 0x28b   : > { %v1823_v59 = vpop.permute.xlu1 %1822 }
 0x28c   : > { %2000 = vst [vmem:[%s3369_s12 + $0x1d0] sm:$0xff] %v1928_v43  ;;  %2001 = vst.msk [vmem:[%s3369_s12 + $0x1d8] sm:$0xff] %vm681_vm1, %v1929_v38  ;;  %v1922_v40 = vadd.f32 %v1823_v59, %v1670_v42  ;;  %v1923_v44 = vadd.f32 %v1823_v59, %v1671_v50  ;;  %v3739_v43 = vld [vmem:[#allocation45_spill] sm:$0xff] }
 0x28d   : > { %v1506_v47 = vpop.permute.xlu0 %1505 }
 0x28e   : > { %1994 = vst [vmem:[%s3369_s12 + $0x1a0] sm:$0xff] %v1922_v40  ;;  %1995 = vst.msk [vmem:[%s3369_s12 + $0x1a8] sm:$0xff] %vm681_vm1, %v1923_v44  ;;  %v1644_v3 = vmul.f32 %v1506_v47, %v3724_v0  ;;  %v1645_v9 = vmul.f32 %v1506_v47, %v3725_v58 }
 0x28f   : > { %v1491_v41 = vpop.permute.xlu1 %1490 }
 0x290   : > { %v1638_v54 = vmul.f32 %v1491_v41, %v3726_v37  ;;  %v1639_v2 = vmul.f32 %v1491_v41, %v3727_v18 }
 0x291   : > { %v1596_v46 = vpop.permute.xlu0 %1595 }
 0x292   : > { %v1680_v36 = vmul.f32 %v1596_v46, %v3728_v20  ;;  %v1681_v35 = vmul.f32 %v1596_v46, %v3729_v24  ;;  %v3743_v24 = vld [vmem:[#allocation63_spill] sm:$0xff] }
 0x293   : > { %v1581_v22 = vpop.permute.xlu1 %1580 }
 0x294   : > { %v1674_v15 = vmul.f32 %v1581_v22, %v3730_v13  ;;  %v1675_v23 = vmul.f32 %v1581_v22, %v3731_v21 }
 0x295   : > { %v1758_v8 = vpop.permute.xlu0 %1757 }
 0x296   : > { %v1896_v45 = vadd.f32 %v1758_v8, %v1644_v3  ;;  %v1897_v49 = vadd.f32 %v1758_v8, %v1645_v9  ;;  %v3740_v9 = vld [vmem:[#allocation62_spill] sm:$0xff] }
 0x297   : > { %v1743_v33 = vpop.permute.xlu1 %1742 }
 0x298   : > { %1968 = vst [vmem:[%s3369_s12 + $0xd0] sm:$0xff] %v1896_v45  ;;  %1969 = vst.msk [vmem:[%s3369_s12 + $0xd8] sm:$0xff] %vm681_vm1, %v1897_v49  ;;  %v1890_v51 = vadd.f32 %v1743_v33, %v1638_v54  ;;  %v1891_v11 = vadd.f32 %v1743_v33, %v1639_v2  ;;  %v3741_v54 = vld [vmem:[#allocation50_spill] sm:$0xff]  ;;  %v3742_v2 = vld [vmem:[#allocation52_spill] sm:$0xff] }
 0x299   : > { %v1848_v5 = vpop.permute.xlu0 %1847 }
 0x29a   : > { %1962 = vst [vmem:[%s3369_s12 + $0xa0] sm:$0xff] %v1890_v51  ;;  %1963 = vst.msk [vmem:[%s3369_s12 + $0xa8] sm:$0xff] %vm681_vm1, %v1891_v11  ;;  %v1932_v25 = vadd.f32 %v1848_v5, %v1680_v36  ;;  %v1933_v27 = vadd.f32 %v1848_v5, %v1681_v35  ;;  %v3744_v5 = vld [vmem:[#allocation51_spill] sm:$0xff] }
 0x29b   : > { %v1833_v55 = vpop.permute.xlu1 %1832 }
 0x29c   : > { %2004 = vst [vmem:[%s3369_s12 + $0x1f0] sm:$0xff] %v1932_v25  ;;  %2005 = vst.msk [vmem:[%s3369_s12 + $0x1f8] sm:$0xff] %vm681_vm1, %v1933_v27  ;;  %v1926_v63 = vadd.f32 %v1833_v55, %v1674_v15  ;;  %v1927_v62 = vadd.f32 %v1833_v55, %v1675_v23  ;;  %v3745_v15 = vld [vmem:[#allocation53_spill] sm:$0xff] }
 0x29d   : > { %v1516_v1 = vpop.permute.xlu0 %1515 }
 0x29e   : > { %1998 = vst [vmem:[%s3369_s12 + $0x1c0] sm:$0xff] %v1926_v63  ;;  %1999 = vst.msk [vmem:[%s3369_s12 + $0x1c8] sm:$0xff] %vm681_vm1, %v1927_v62  ;;  %v1648_v16 = vmul.f32 %v1516_v1, %v3732_v14  ;;  %v1649_v61 = vmul.f32 %v1516_v1, %v3733_v48  ;;  %v3746_v1 = vld [vmem:[#allocation58_spill] sm:$0xff] }
 0x29f   : > { %v1501_v17 = vpop.permute.xlu1 %1500 }
 0x2a0   : > { %v1642_v19 = vmul.f32 %v1501_v17, %v3734_v60  ;;  %v1643_v4 = vmul.f32 %v1501_v17, %v3735_v53  ;;  %v3749_v60 = vld [vmem:[#allocation61_spill] sm:$0xff] }
 0x2a1   : > { %v1606_v30 = vpop.permute.xlu0 %1605 }
 0x2a2   : > { %v1684_v39 = vmul.f32 %v1606_v30, %v3736_v29  ;;  %v1685_v34 = vmul.f32 %v1606_v30, %v3737_v12  ;;  %v3747_v30 = vld [vmem:[#allocation60_spill] sm:$0xff] }
 0x2a3   : > { %v1591_v26 = vpop.permute.xlu1 %1590 }
 0x2a4   : > { %v1678_v50 = vmul.f32 %v1591_v26, %v3738_v52  ;;  %v1679_v38 = vmul.f32 %v1591_v26, %v3739_v43 }
 0x2a5   : > { %v1768_v7 = vpop.permute.xlu0 %1767 }
 0x2a6   : > { %v1900_v6 = vadd.f32 %v1768_v7, %v1648_v16  ;;  %v1901_v32 = vadd.f32 %v1768_v7, %v1649_v61  ;;  %v3748_v61 = vld [vmem:[#allocation59_spill] sm:$0xff] }
 0x2a7   : > { %v1753_v57 = vpop.permute.xlu1 %1752 }
 0x2a8   : > { %1972 = vst [vmem:[%s3369_s12 + $0xf0] sm:$0xff] %v1900_v6  ;;  %1973 = vst.msk [vmem:[%s3369_s12 + $0xf8] sm:$0xff] %vm681_vm1, %v1901_v32  ;;  %v1894_v28 = vadd.f32 %v1753_v57, %v1642_v19  ;;  %v1895_v56 = vadd.f32 %v1753_v57, %v1643_v4 }
 0x2a9   : > { %v1858_v42 = vpop.permute.xlu0 %1857 }
 0x2aa   : > { %1966 = vst [vmem:[%s3369_s12 + $0xc0] sm:$0xff] %v1894_v28  ;;  %1967 = vst.msk [vmem:[%s3369_s12 + $0xc8] sm:$0xff] %vm681_vm1, %v1895_v56  ;;  %v1936_v59 = vadd.f32 %v1858_v42, %v1684_v39  ;;  %v1937_v40 = vadd.f32 %v1858_v42, %v1685_v34 }
 0x2ab   : > { %v1843_v44 = vpop.permute.xlu1 %1842 }
 0x2ac   : > { %2008 = vst [vmem:[%s3369_s12 + $0x210] sm:$0xff] %v1936_v59  ;;  %2009 = vst.msk [vmem:[%s3369_s12 + $0x218] sm:$0xff] %vm681_vm1, %v1937_v40  ;;  %v1930_v47 = vadd.f32 %v1843_v44, %v1678_v50  ;;  %v1931_v41 = vadd.f32 %v1843_v44, %v1679_v38 }
 0x2ad   : > { %v1526_v46 = vpop.permute.xlu0 %1525 }
 0x2ae   : > { %2002 = vst [vmem:[%s3369_s12 + $0x1e0] sm:$0xff] %v1930_v47  ;;  %2003 = vst.msk [vmem:[%s3369_s12 + $0x1e8] sm:$0xff] %vm681_vm1, %v1931_v41  ;;  %v1652_v58 = vmul.f32 %v1526_v46, %v3030_v31  ;;  %v1653_v8 = vmul.f32 %v1526_v46, %v3740_v9 }
 0x2af   : > { %v1511_v22 = vpop.permute.xlu1 %1510 }
 0x2b0   : > { %v1646_v18 = vmul.f32 %v1511_v22, %v3741_v54  ;;  %v1647_v45 = vmul.f32 %v1511_v22, %v3742_v2 }
 0x2b1   : > { %v1616_v0 = vpop.permute.xlu0 %1615 }
 0x2b2   : > { %v1688_v36 = vmul.f32 %v1616_v0, %v3036_v10  ;;  %v1689_v35 = vmul.f32 %v1616_v0, %v3743_v24 }
 0x2b3   : > { %v1601_v3 = vpop.permute.xlu1 %1600 }
 0x2b4   : > { %v1682_v13 = vmul.f32 %v1601_v3, %v3744_v5  ;;  %v1683_v21 = vmul.f32 %v1601_v3, %v3745_v15 }
 0x2b5   : > { %v1778_v37 = vpop.permute.xlu0 %1777 }
 0x2b6   : > { %v1904_v49 = vadd.f32 %v1778_v37, %v1652_v58  ;;  %v1905_v33 = vadd.f32 %v1778_v37, %v1653_v8 }
 0x2b7   : > { %v1763_v20 = vpop.permute.xlu1 %1762 }
 0x2b8   : > { %1976 = vst [vmem:[%s3369_s12 + $0x110] sm:$0xff] %v1904_v49  ;;  %1977 = vst.msk [vmem:[%s3369_s12 + $0x118] sm:$0xff] %vm681_vm1, %v1905_v33  ;;  %v1898_v31 = vadd.f32 %v1763_v20, %v1646_v18  ;;  %v1899_v51 = vadd.f32 %v1763_v20, %v1647_v45 }
 0x2b9   : > { %v1868_v11 = vpop.permute.xlu0 %1867 }
 0x2ba   : > { %1970 = vst [vmem:[%s3369_s12 + $0xe0] sm:$0xff] %v1898_v31  ;;  %1971 = vst.msk [vmem:[%s3369_s12 + $0xe8] sm:$0xff] %vm681_vm1, %v1899_v51  ;;  %v1940_v23 = vadd.f32 %v1868_v11, %v1688_v36  ;;  %v1941_v25 = vadd.f32 %v1868_v11, %v1689_v35 }
 0x2bb   : > { %v1853_v10 = vpop.permute.xlu1 %1852 }
 0x2bc   : > { %2012 = vst [vmem:[%s3369_s12 + $0x230] sm:$0xff] %v1940_v23  ;;  %2013 = vst.msk [vmem:[%s3369_s12 + $0x238] sm:$0xff] %vm681_vm1, %v1941_v25  ;;  %v1934_v27 = vadd.f32 %v1853_v10, %v1682_v13  ;;  %v1935_v55 = vadd.f32 %v1853_v10, %v1683_v21 }
 0x2be   : > { %2006 = vst [vmem:[%s3369_s12 + $0x200] sm:$0xff] %v1934_v27  ;;  %2007 = vst.msk [vmem:[%s3369_s12 + $0x208] sm:$0xff] %vm681_vm1, %v1935_v55 }
 0x2bf   : > { %v1521_v63 = vpop.permute.xlu1 %1520 }
 0x2c0   : > { %v1650_v17 = vmul.f32 %v1521_v63, %v3746_v1  ;;  %v1651_v26 = vmul.f32 %v1521_v63, %v3747_v30 }
 0x2c3   : > { %v1611_v62 = vpop.permute.xlu1 %1610 }
 0x2c4   : > { %v1686_v7 = vmul.f32 %v1611_v62, %v3748_v61  ;;  %v1687_v19 = vmul.f32 %v1611_v62, %v3749_v60 }
 0x2c7   : > { %v1773_v14 = vpop.permute.xlu1 %1772 }
 0x2c8   : > { %v1902_v16 = vadd.f32 %v1773_v14, %v1650_v17  ;;  %v1903_v48 = vadd.f32 %v1773_v14, %v1651_v26 }
 0x2ca   : > { %1974 = vst [vmem:[%s3369_s12 + $0x100] sm:$0xff] %v1902_v16  ;;  %1975 = vst.msk [vmem:[%s3369_s12 + $0x108] sm:$0xff] %vm681_vm1, %v1903_v48 }
 0x2cb   : > { %v1863_v53 = vpop.permute.xlu1 %1862 }
 0x2cc   : > { %v1938_v4 = vadd.f32 %v1863_v53, %v1686_v7  ;;  %v1939_v6 = vadd.f32 %v1863_v53, %v1687_v19 }
 0x2ce   : > { %2010 = vst [vmem:[%s3369_s12 + $0x220] sm:$0xff] %v1938_v4  ;;  %2011 = vst.msk [vmem:[%s3369_s12 + $0x228] sm:$0xff] %vm681_vm1, %v1939_v6 }
 0x2cf PF: > { %s15_s18 = sadd.s32 1, %s2228_s18  }
 0x2d0   : > { %p12_p4 = scmp.ge.s32.totalorder %s15_s18, 4  }
 0x2d2   :  { %14 = sbr.rel (!%p12_p4) target bundleno = 1 (0x1), region = 76 }

</bundles_post_ra>
